<compile_context>
chip_gen: v6e
topology: v6e:2x2x1
jax: 0.10.0
libtpu: 0.0.40
codegen_flags: <defaults>
</compile_context>

<pallas_src>
import functools
import math

import jax
import jax.numpy as jnp
from jax import lax
from jax.experimental import pallas as pl
from jax.experimental.pallas import tpu as pltpu


_MM_DTYPE = jnp.bfloat16   # MXU input dtype; accumulation is always f32.
_LN_EPS = 1e-5


# ------------------------------ in-kernel math ------------------------------

def _gelu_tanh(x):
    c = jnp.float32(0.7978845608028654)
    return 0.5 * x * (1.0 + jnp.tanh(c * (x + 0.044715 * x * x * x)))


def _layer_norm(x, g, b, eps):
    mu = jnp.mean(x, axis=-1, keepdims=True)
    var = jnp.mean(jnp.square(x - mu), axis=-1, keepdims=True)
    return (x - mu) * lax.rsqrt(var + jnp.float32(eps)) * g + b


def _cross_attn_ln(qin_f32, kvin_f32, wq, bq, wkv, bkv, wo, bo, g, b,
                   n_heads, eps, want_weights):
    """LN(qin + MHA(q=qin, kv=kvin)) for one batch element, all heads.

    No explicit head transposes: heads are processed with static lane-slices of the
    fused projections and plain 2-D MXU dots; the output projection is accumulated
    per head from row-blocks of Wo.  Wq/bq are pre-scaled by 1/sqrt(dh) at init.
    """
    Sq, Dq = qin_f32.shape
    Skv = kvin_f32.shape[0]
    dh = Dq // n_heads

    qin = qin_f32.astype(_MM_DTYPE)
    kvin = kvin_f32.astype(_MM_DTYPE)

    # Fused projections: bf16 MXU inputs, f32 accumulation.
    q = jnp.dot(qin, wq, preferred_element_type=jnp.float32) + bq        # (Sq, Dq)
    kv = jnp.dot(kvin, wkv, preferred_element_type=jnp.float32) + bkv    # (Skv, 2*Dq)
    qb = q.astype(_MM_DTYPE)
    kb = kv[:, :Dq].astype(_MM_DTYPE)
    vb = kv[:, Dq:].astype(_MM_DTYPE)

    attn = jnp.zeros((Sq, Dq), jnp.float32)
    p_sum = jnp.zeros((Sq, Skv), jnp.float32)
    trans_rhs = (((1,), (1,)), ((), ()))   # contract the last dims: q_h @ k_h^T

    for h in range(n_heads):               # static unroll; n_heads is small
        lo, hi = h * dh, (h + 1) * dh
        q_h = qb[:, lo:hi]                 # (Sq, dh)
        k_h = kb[:, lo:hi]                 # (Skv, dh)
        v_h = vb[:, lo:hi]                 # (Skv, dh)

        s = lax.dot_general(q_h, k_h, trans_rhs,
                            preferred_element_type=jnp.float32)          # (Sq, Skv)
        s = s - jnp.max(s, axis=-1, keepdims=True)
        e = jnp.exp(s)
        denom = jnp.sum(e, axis=-1, keepdims=True)
        # Exact reciprocal when the (user-facing) attention weights are requested.
        p = e * pl.reciprocal(denom, approx=not want_weights)

        ctx = jnp.dot(p.astype(_MM_DTYPE), v_h,
                      preferred_element_type=jnp.float32)                # (Sq, dh)
        # Output projection accumulated per head: rows [lo:hi) of Wo (no concat).
        attn = attn + jnp.dot(ctx.astype(_MM_DTYPE), wo[lo:hi, :],
                              preferred_element_type=jnp.float32)
        if want_weights:
            p_sum = p_sum + p

    y = _layer_norm(attn + bo + qin_f32, g, b, eps)                      # residual in f32
    pw = p_sum * jnp.float32(1.0 / n_heads) if want_weights else None
    return y, pw


def _ffn_ln(x_f32, w1, b1, w2, b2, g, b, eps):
    """LN(x + W2 @ GELU(W1 @ x)); residual stays f32, MXU inputs bf16."""
    xb = x_f32.astype(_MM_DTYPE)
    h = jnp.dot(xb, w1, preferred_element_type=jnp.float32) + b1
    h = _gelu_tanh(h).astype(_MM_DTYPE)
    y = jnp.dot(h, w2, preferred_element_type=jnp.float32) + b2
    return _layer_norm(y + x_f32, g, b, eps)


# ----------------------- fully fused FusionBlock kernel ----------------------
# One batch element per grid step (grid=(B,), "parallel"); both cross-attention
# directions, both FFN branches and all residual/LN epilogues in a single body.
# TODO(synk): for v7x with B == 1 the single-step grid leaves one TensorCore idle;
#             split over a (B, 2) direction grid (heterogeneous shapes permitting).

def _fusion_block_kernel(*refs, n_heads, eps, return_weights):
    n_out = 4 if return_weights else 2
    (v_ref, l_ref,
     vq_w, vq_b, vkv_w, vkv_b, vo_w, vo_b, vln1_g, vln1_b,
     lq_w, lq_b, lkv_w, lkv_b, lo_w, lo_b, lln1_g, lln1_b,
     vf_w1, vf_b1, vf_w2, vf_b2, vln2_g, vln2_b,
     lf_w1, lf_b1, lf_w2, lf_b2, lln2_g, lln2_b) = refs[:-n_out]
    out_refs = refs[-n_out:]

    vis = v_ref[0].astype(jnp.float32)     # (Sv, Dv)
    llm = l_ref[0].astype(jnp.float32)     # (Sl, Dl)

    # Parallel bidirectional cross attention on the layer *inputs*.
    v1, v_p = _cross_attn_ln(vis, llm, vq_w[...], vq_b[...], vkv_w[...], vkv_b[...],
                             vo_w[...], vo_b[...], vln1_g[...], vln1_b[...],
                             n_heads, eps, return_weights)
    l1, l_p = _cross_attn_ln(llm, vis, lq_w[...], lq_b[...], lkv_w[...], lkv_b[...],
                             lo_w[...], lo_b[...], lln1_g[...], lln1_b[...],
                             n_heads, eps, return_weights)

    # Position-wise FFN + residual + LayerNorm on each stream.
    v2 = _ffn_ln(v1, vf_w1[...], vf_b1[...], vf_w2[...], vf_b2[...],
                 vln2_g[...], vln2_b[...], eps)
    l2 = _ffn_ln(l1, lf_w1[...], lf_b1[...], lf_w2[...], lf_b2[...],
                 lln2_g[...], lln2_b[...], eps)

    out_refs[0][0] = v2.astype(out_refs[0].dtype)
    out_refs[1][0] = l2.astype(out_refs[1].dtype)
    if return_weights:
        out_refs[2][0] = v_p.astype(out_refs[2].dtype)   # head-averaged attn weights
        out_refs[3][0] = l_p.astype(out_refs[3].dtype)


def _nbytes(shape, dtype):
    return math.prod(shape) * jnp.dtype(dtype).itemsize


def fusion_block(vision, llm, p, n_heads, need_weights, eps=_LN_EPS):
    """One FusionBlock layer as a single fused pallas_call."""
    B, Sv, Dv = vision.shape
    _, Sl, Dl = llm.shape
    Hv = p["v_ffn"]["w1"].shape[1]
    Hl = p["l_ffn"]["w1"].shape[1]

    def act_spec(s1, s2):
        return pl.BlockSpec((1, s1, s2), lambda bi: (bi, 0, 0))

    def w_spec(arr):
        return pl.BlockSpec(arr.shape, lambda bi, _nd=arr.ndim: (0,) * _nd)

    operands = [
        vision, llm,
        p["v_cross"]["wq"], p["v_cross"]["bq"], p["v_cross"]["wkv"], p["v_cross"]["bkv"],
        p["v_cross"]["wo"], p["v_cross"]["bo"], p["v_ln1"]["g"], p["v_ln1"]["b"],
        p["l_cross"]["wq"], p["l_cross"]["bq"], p["l_cross"]["wkv"], p["l_cross"]["bkv"],
        p["l_cross"]["wo"], p["l_cross"]["bo"], p["l_ln1"]["g"], p["l_ln1"]["b"],
        p["v_ffn"]["w1"], p["v_ffn"]["b1"], p["v_ffn"]["w2"], p["v_ffn"]["b2"],
        p["v_ln2"]["g"], p["v_ln2"]["b"],
        p["l_ffn"]["w1"], p["l_ffn"]["b1"], p["l_ffn"]["w2"], p["l_ffn"]["b2"],
        p["l_ln2"]["g"], p["l_ln2"]["b"],
    ]
    in_specs = [act_spec(Sv, Dv), act_spec(Sl, Dl)] + [w_spec(a) for a in operands[2:]]

    out_specs = [act_spec(Sv, Dv), act_spec(Sl, Dl)]
    out_shape = [jax.ShapeDtypeStruct((B, Sv, Dv), vision.dtype),
                 jax.ShapeDtypeStruct((B, Sl, Dl), llm.dtype)]
    if need_weights:
        # TODO(synk): pad Skv to a multiple of 128 for a lane-dense weights slab.
        out_specs += [act_spec(Sv, Sl), act_spec(Sl, Sv)]
        out_shape += [jax.ShapeDtypeStruct((B, Sv, Sl), jnp.float32),
                      jax.ShapeDtypeStruct((B, Sl, Sv), jnp.float32)]

    # --- explicit VMEM budget: every operand/result block is double-buffered.
    blk_bytes = (_nbytes((Sv, Dv), vision.dtype) + _nbytes((Sl, Dl), llm.dtype)) * 2
    blk_bytes += sum(a.size * a.dtype.itemsize for a in operands[2:])
    if need_weights:
        blk_bytes += _nbytes((Sv, Sl), jnp.float32) + _nbytes((Sl, Sv), jnp.float32)
    vmem_limit = int(min(64 * 2**20, max(16 * 2**20, 2 * blk_bytes + 4 * 2**20)))

    # --- advisory cost estimate for XLA's scheduler.
    def attn_flops(Sq, Dq, Skv, Dkv):
        return 2 * (Sq * Dq * Dq + Skv * Dkv * 2 * Dq + 2 * Sq * Skv * Dq + Sq * Dq * Dq)
    flops = B * (attn_flops(Sv, Dv, Sl, Dl) + attn_flops(Sl, Dl, Sv, Dv)
                 + 4 * Sv * Dv * Hv + 4 * Sl * Dl * Hl)
    transc = B * (2 * n_heads * Sv * Sl + Sv * Hv + Sl * Hl)
    bytes_accessed = (sum(a.size * a.dtype.itemsize for a in operands)
                      + sum(_nbytes(s.shape, s.dtype) for s in out_shape))

    kernel = functools.partial(_fusion_block_kernel, n_heads=n_heads, eps=eps,
                               return_weights=need_weights)
    outs = pl.pallas_call(
        kernel,
        grid=(B,),
        in_specs=in_specs,
        out_specs=out_specs,
        out_shape=out_shape,
        compiler_params=pltpu.CompilerParams(
            dimension_semantics=("parallel",),
            vmem_limit_bytes=vmem_limit),
        cost_estimate=pl.CostEstimate(flops=int(flops), transcendentals=int(transc),
                                      bytes_accessed=int(bytes_accessed)),
    )(*operands)

    if need_weights:
        v_out, l_out, v_w, l_w = outs
    else:
        (v_out, l_out), (v_w, l_w) = outs, (None, None)
    return v_out, l_out, v_w, l_w


# ------------------------------ model (glue) --------------------------------

def deep_fusion_forward(params, vision_input, llm_input,
                        vision_mask=None, llm_mask=None, attn_mask=None,
                        need_weights=False):
    # Streams stay f32 between layers (residual parity with the PyTorch reference);
    # bf16 only at MXU inputs inside the kernel.
    vision = vision_input.astype(jnp.float32)
    llm = llm_input.astype(jnp.float32)
    n_layers = len(params["layers"])
    v_w = l_w = None
    for i, layer_p in enumerate(params["layers"]):
        # Only the last layer's (head-averaged) weights are ever returned.
        want_w = bool(need_weights) and (i == n_layers - 1)
        vision, llm, vw, lw = fusion_block(vision, llm, layer_p, params["n_heads"], want_w)
        if want_w:
            v_w, l_w = vw, lw
    return {"vision_output": vision.astype(vision_input.dtype),
            "llm_output": llm.astype(llm_input.dtype),
            "vision_attn_weights": v_w, "llm_attn_weights": l_w}


# ---------------------------- parameter init ---------------------------------

def _init_linear(key, d_in, d_out):
    w = jax.random.normal(key, (d_in, d_out), jnp.float32) * 0.02
    b = jnp.zeros((1, d_out), jnp.float32)
    return w, b


def _init_mha(key, d_q, d_kv, n_heads):
    ks = jax.random.split(key, 4)
    wq, bq = _init_linear(ks[0], d_q, d_q)
    wk, bk = _init_linear(ks[1], d_kv, d_q)
    wv, bv = _init_linear(ks[2], d_kv, d_q)
    wo, bo = _init_linear(ks[3], d_q, d_q)
    # Fold the 1/sqrt(dh) attention scale into the Q projection (one-time transform).
    scale = 1.0 / float(d_q // n_heads) ** 0.5
    wq, bq = wq * scale, bq * scale
    # Fused K|V projection weight: (d_kv, 2*d_q).
    return {"wq": wq.astype(_MM_DTYPE), "bq": bq,
            "wkv": jnp.concatenate([wk, wv], axis=1).astype(_MM_DTYPE),
            "bkv": jnp.concatenate([bk, bv], axis=1),
            "wo": wo.astype(_MM_DTYPE), "bo": bo}


def _init_ffn(key, d, mult):
    k1, k2 = jax.random.split(key)
    w1, b1 = _init_linear(k1, d, d * mult)
    w2, b2 = _init_linear(k2, d * mult, d)
    return {"w1": w1.astype(_MM_DTYPE), "b1": b1, "w2": w2.astype(_MM_DTYPE), "b2": b2}


def _init_ln(d):
    return {"g": jnp.ones((1, d), jnp.float32), "b": jnp.zeros((1, d), jnp.float32)}


def init_deep_fusion(key, n_layers, vision_dim, llm_dim, n_heads, ffn_multiplier):
    layers = []
    for i in range(n_layers):
        k = jax.random.fold_in(key, i)
        k1, k2, k3, k4 = jax.random.split(k, 4)
        layers.append({
            "v_cross": _init_mha(k1, vision_dim, llm_dim, n_heads),
            "l_cross": _init_mha(k2, llm_dim, vision_dim, n_heads),
            "v_ffn": _init_ffn(k3, vision_dim, ffn_multiplier),
            "l_ffn": _init_ffn(k4, llm_dim, ffn_multiplier),
            "v_ln1": _init_ln(vision_dim), "v_ln2": _init_ln(vision_dim),
            "l_ln1": _init_ln(llm_dim), "l_ln2": _init_ln(llm_dim),
        })
    return {"layers": layers, "n_heads": n_heads}


# ---------------------------------- main -------------------------------------

if __name__ == "__main__":
    n_layers = 2
    vision_dim, llm_dim = 32, 64
    n_heads, ffn_mult = 4, 4
    B, S_vision, S_llm = 2, 16, 8

    root = jax.random.PRNGKey(0)
    k_params, k_v, k_l = jax.random.split(root, 3)

    params = init_deep_fusion(k_params, n_layers, vision_dim, llm_dim, n_heads, ffn_mult)
    vision_input = jax.random.normal(k_v, (B, S_vision, vision_dim), jnp.float32)
    llm_input = jax.random.normal(k_l, (B, S_llm, llm_dim), jnp.float32)

    out = deep_fusion_forward(params, vision_input, llm_input, need_weights=True)
    jax.block_until_ready(out["vision_output"])
    jax.block_until_ready(out["llm_output"])
    jax.block_until_ready(out["vision_attn_weights"])
    jax.block_until_ready(out["llm_attn_weights"])

    assert out["vision_output"].shape == (B, S_vision, vision_dim)
    assert out["llm_output"].shape == (B, S_llm, llm_dim)
    assert out["vision_attn_weights"].shape == (B, S_vision, S_llm)
    assert out["llm_attn_weights"].shape == (B, S_llm, S_vision)

    # need_weights=False path: weight outputs are skipped entirely.
    out2 = deep_fusion_forward(params, vision_input, llm_input, need_weights=False)
    jax.block_until_ready(out2["vision_output"])
    assert out2["vision_attn_weights"] is None and out2["llm_attn_weights"] is None

    print("KERNEL_OK")
</pallas_src>

<mosaic_0001>
module attributes {stable_mosaic.version = 11 : i64} {
  func.func @_fusion_block_kernel(%arg0: i32, %arg1: memref<1x16x32xf32, #tpu.memory_space<vmem>>, %arg2: memref<1x8x64xf32, #tpu.memory_space<vmem>>, %arg3: memref<32x32xbf16, #tpu.memory_space<vmem>>, %arg4: memref<1x32xf32, #tpu.memory_space<vmem>>, %arg5: memref<64x64xbf16, #tpu.memory_space<vmem>>, %arg6: memref<1x64xf32, #tpu.memory_space<vmem>>, %arg7: memref<32x32xbf16, #tpu.memory_space<vmem>>, %arg8: memref<1x32xf32, #tpu.memory_space<vmem>>, %arg9: memref<1x32xf32, #tpu.memory_space<vmem>>, %arg10: memref<1x32xf32, #tpu.memory_space<vmem>>, %arg11: memref<64x64xbf16, #tpu.memory_space<vmem>>, %arg12: memref<1x64xf32, #tpu.memory_space<vmem>>, %arg13: memref<32x128xbf16, #tpu.memory_space<vmem>>, %arg14: memref<1x128xf32, #tpu.memory_space<vmem>>, %arg15: memref<64x64xbf16, #tpu.memory_space<vmem>>, %arg16: memref<1x64xf32, #tpu.memory_space<vmem>>, %arg17: memref<1x64xf32, #tpu.memory_space<vmem>>, %arg18: memref<1x64xf32, #tpu.memory_space<vmem>>, %arg19: memref<32x128xbf16, #tpu.memory_space<vmem>>, %arg20: memref<1x128xf32, #tpu.memory_space<vmem>>, %arg21: memref<128x32xbf16, #tpu.memory_space<vmem>>, %arg22: memref<1x32xf32, #tpu.memory_space<vmem>>, %arg23: memref<1x32xf32, #tpu.memory_space<vmem>>, %arg24: memref<1x32xf32, #tpu.memory_space<vmem>>, %arg25: memref<64x256xbf16, #tpu.memory_space<vmem>>, %arg26: memref<1x256xf32, #tpu.memory_space<vmem>>, %arg27: memref<256x64xbf16, #tpu.memory_space<vmem>>, %arg28: memref<1x64xf32, #tpu.memory_space<vmem>>, %arg29: memref<1x64xf32, #tpu.memory_space<vmem>>, %arg30: memref<1x64xf32, #tpu.memory_space<vmem>>, %arg31: memref<1x16x32xf32, #tpu.memory_space<vmem>>, %arg32: memref<1x8x64xf32, #tpu.memory_space<vmem>>) attributes {dimension_semantics = [#tpu.dimension_semantics<parallel>], iteration_bounds = array<i64: 2>, scalar_prefetch = 0 : i64, scratch_operands = 0 : i64, tpu.core_type = #tpu.core_type<tc>, window_params = [{transform_indices = @transform_0, window_bounds = array<i64: 1, 16, 32>}, {transform_indices = @transform_1, window_bounds = array<i64: 1, 8, 64>}, {pipeline_mode = #tpu.pipeline_mode<synchronous>, transform_indices = @transform_2, window_bounds = array<i64: 32, 32>}, {pipeline_mode = #tpu.pipeline_mode<synchronous>, transform_indices = @transform_3, window_bounds = array<i64: 1, 32>}, {pipeline_mode = #tpu.pipeline_mode<synchronous>, transform_indices = @transform_4, window_bounds = array<i64: 64, 64>}, {pipeline_mode = #tpu.pipeline_mode<synchronous>, transform_indices = @transform_5, window_bounds = array<i64: 1, 64>}, {pipeline_mode = #tpu.pipeline_mode<synchronous>, transform_indices = @transform_6, window_bounds = array<i64: 32, 32>}, {pipeline_mode = #tpu.pipeline_mode<synchronous>, transform_indices = @transform_7, window_bounds = array<i64: 1, 32>}, {pipeline_mode = #tpu.pipeline_mode<synchronous>, transform_indices = @transform_8, window_bounds = array<i64: 1, 32>}, {pipeline_mode = #tpu.pipeline_mode<synchronous>, transform_indices = @transform_9, window_bounds = array<i64: 1, 32>}, {pipeline_mode = #tpu.pipeline_mode<synchronous>, transform_indices = @transform_10, window_bounds = array<i64: 64, 64>}, {pipeline_mode = #tpu.pipeline_mode<synchronous>, transform_indices = @transform_11, window_bounds = array<i64: 1, 64>}, {pipeline_mode = #tpu.pipeline_mode<synchronous>, transform_indices = @transform_12, window_bounds = array<i64: 32, 128>}, {pipeline_mode = #tpu.pipeline_mode<synchronous>, transform_indices = @transform_13, window_bounds = array<i64: 1, 128>}, {pipeline_mode = #tpu.pipeline_mode<synchronous>, transform_indices = @transform_14, window_bounds = array<i64: 64, 64>}, {pipeline_mode = #tpu.pipeline_mode<synchronous>, transform_indices = @transform_15, window_bounds = array<i64: 1, 64>}, {pipeline_mode = #tpu.pipeline_mode<synchronous>, transform_indices = @transform_16, window_bounds = array<i64: 1, 64>}, {pipeline_mode = #tpu.pipeline_mode<synchronous>, transform_indices = @transform_17, window_bounds = array<i64: 1, 64>}, {pipeline_mode = #tpu.pipeline_mode<synchronous>, transform_indices = @transform_18, window_bounds = array<i64: 32, 128>}, {pipeline_mode = #tpu.pipeline_mode<synchronous>, transform_indices = @transform_19, window_bounds = array<i64: 1, 128>}, {pipeline_mode = #tpu.pipeline_mode<synchronous>, transform_indices = @transform_20, window_bounds = array<i64: 128, 32>}, {pipeline_mode = #tpu.pipeline_mode<synchronous>, transform_indices = @transform_21, window_bounds = array<i64: 1, 32>}, {pipeline_mode = #tpu.pipeline_mode<synchronous>, transform_indices = @transform_22, window_bounds = array<i64: 1, 32>}, {pipeline_mode = #tpu.pipeline_mode<synchronous>, transform_indices = @transform_23, window_bounds = array<i64: 1, 32>}, {pipeline_mode = #tpu.pipeline_mode<synchronous>, transform_indices = @transform_24, window_bounds = array<i64: 64, 256>}, {pipeline_mode = #tpu.pipeline_mode<synchronous>, transform_indices = @transform_25, window_bounds = array<i64: 1, 256>}, {pipeline_mode = #tpu.pipeline_mode<synchronous>, transform_indices = @transform_26, window_bounds = array<i64: 256, 64>}, {pipeline_mode = #tpu.pipeline_mode<synchronous>, transform_indices = @transform_27, window_bounds = array<i64: 1, 64>}, {pipeline_mode = #tpu.pipeline_mode<synchronous>, transform_indices = @transform_28, window_bounds = array<i64: 1, 64>}, {pipeline_mode = #tpu.pipeline_mode<synchronous>, transform_indices = @transform_29, window_bounds = array<i64: 1, 64>}, {transform_indices = @transform_30, window_bounds = array<i64: 1, 16, 32>}, {transform_indices = @transform_31, window_bounds = array<i64: 1, 8, 64>}]} {
    %c0 = arith.constant 0 : index
    %c0_0 = arith.constant 0 : index
    %c0_1 = arith.constant 0 : index
    %0 = vector.load %arg1[%c0, %c0_0, %c0_1] : memref<1x16x32xf32, #tpu.memory_space<vmem>>, vector<1x16x32xf32>
    %1 = vector.shape_cast %0 : vector<1x16x32xf32> to vector<16x32xf32>
    %c0_2 = arith.constant 0 : index
    %c0_3 = arith.constant 0 : index
    %c0_4 = arith.constant 0 : index
    %2 = vector.load %arg2[%c0_2, %c0_3, %c0_4] : memref<1x8x64xf32, #tpu.memory_space<vmem>>, vector<1x8x64xf32>
    %3 = vector.shape_cast %2 : vector<1x8x64xf32> to vector<8x64xf32>
    %c0_5 = arith.constant 0 : index
    %c0_6 = arith.constant 0 : index
    %4 = vector.load %arg3[%c0_5, %c0_6] : memref<32x32xbf16, #tpu.memory_space<vmem>>, vector<32x32xbf16>
    %c0_7 = arith.constant 0 : index
    %c0_8 = arith.constant 0 : index
    %5 = vector.load %arg4[%c0_7, %c0_8] : memref<1x32xf32, #tpu.memory_space<vmem>>, vector<1x32xf32>
    %c0_9 = arith.constant 0 : index
    %c0_10 = arith.constant 0 : index
    %6 = vector.load %arg5[%c0_9, %c0_10] : memref<64x64xbf16, #tpu.memory_space<vmem>>, vector<64x64xbf16>
    %c0_11 = arith.constant 0 : index
    %c0_12 = arith.constant 0 : index
    %7 = vector.load %arg6[%c0_11, %c0_12] : memref<1x64xf32, #tpu.memory_space<vmem>>, vector<1x64xf32>
    %c0_13 = arith.constant 0 : index
    %c0_14 = arith.constant 0 : index
    %8 = vector.load %arg7[%c0_13, %c0_14] : memref<32x32xbf16, #tpu.memory_space<vmem>>, vector<32x32xbf16>
    %c0_15 = arith.constant 0 : index
    %c0_16 = arith.constant 0 : index
    %9 = vector.load %arg8[%c0_15, %c0_16] : memref<1x32xf32, #tpu.memory_space<vmem>>, vector<1x32xf32>
    %c0_17 = arith.constant 0 : index
    %c0_18 = arith.constant 0 : index
    %10 = vector.load %arg9[%c0_17, %c0_18] : memref<1x32xf32, #tpu.memory_space<vmem>>, vector<1x32xf32>
    %c0_19 = arith.constant 0 : index
    %c0_20 = arith.constant 0 : index
    %11 = vector.load %arg10[%c0_19, %c0_20] : memref<1x32xf32, #tpu.memory_space<vmem>>, vector<1x32xf32>
    %12 = arith.truncf %1 : vector<16x32xf32> to vector<16x32xbf16>
    %13 = arith.truncf %3 : vector<8x64xf32> to vector<8x64xbf16>
    %cst = arith.constant dense<0.000000e+00> : vector<16x32xf32>
    %14 = tpu.matmul %12, %4, %cst {dimension_numbers = #tpu.dot_dimension_numbers<[1], [0], [0], [1], [0, 0, 1, 1], [], []>} : vector<16x32xbf16>, vector<32x32xbf16>, vector<16x32xf32> -> vector<16x32xf32>
    %15 = vector.broadcast %5 : vector<1x32xf32> to vector<16x32xf32>
    %16 = arith.addf %14, %15 : vector<16x32xf32>
    %cst_21 = arith.constant dense<0.000000e+00> : vector<8x64xf32>
    %17 = tpu.matmul %13, %6, %cst_21 {dimension_numbers = #tpu.dot_dimension_numbers<[1], [0], [0], [1], [0, 0, 1, 1], [], []>} : vector<8x64xbf16>, vector<64x64xbf16>, vector<8x64xf32> -> vector<8x64xf32>
    %18 = vector.broadcast %7 : vector<1x64xf32> to vector<8x64xf32>
    %19 = arith.addf %17, %18 : vector<8x64xf32>
    %20 = arith.truncf %16 : vector<16x32xf32> to vector<16x32xbf16>
    %21 = vector.extract_strided_slice %19 {offsets = [0, 0], sizes = [8, 32], strides = [1, 1]} : vector<8x64xf32> to vector<8x32xf32>
    %22 = arith.truncf %21 : vector<8x32xf32> to vector<8x32xbf16>
    %23 = vector.extract_strided_slice %19 {offsets = [0, 32], sizes = [8, 32], strides = [1, 1]} : vector<8x64xf32> to vector<8x32xf32>
    %24 = arith.truncf %23 : vector<8x32xf32> to vector<8x32xbf16>
    %cst_22 = arith.constant 0.000000e+00 : f32
    %25 = vector.broadcast %cst_22 : f32 to vector<16x32xf32>
    %26 = vector.extract_strided_slice %20 {offsets = [0, 0], sizes = [16, 8], strides = [1, 1]} : vector<16x32xbf16> to vector<16x8xbf16>
    %27 = vector.extract_strided_slice %22 {offsets = [0, 0], sizes = [8, 8], strides = [1, 1]} : vector<8x32xbf16> to vector<8x8xbf16>
    %28 = vector.extract_strided_slice %24 {offsets = [0, 0], sizes = [8, 8], strides = [1, 1]} : vector<8x32xbf16> to vector<8x8xbf16>
    %cst_23 = arith.constant dense<0.000000e+00> : vector<16x8xf32>
    %29 = tpu.matmul %26, %27, %cst_23 {dimension_numbers = #tpu.dot_dimension_numbers<[1], [1], [0], [0], [0, 0, 1, 0], [], []>} : vector<16x8xbf16>, vector<8x8xbf16>, vector<16x8xf32> -> vector<16x8xf32>
    %cst_24 = arith.constant dense<0xFF800000> : vector<16xf32>
    %30 = vector.multi_reduction <maximumf>, %29, %cst_24 [1] : vector<16x8xf32> to vector<16xf32>
    %31 = vector.shape_cast %30 : vector<16xf32> to vector<16x1xf32>
    %32 = vector.broadcast %31 : vector<16x1xf32> to vector<16x8xf32>
    %33 = arith.subf %29, %32 : vector<16x8xf32>
    %34 = math.exp %33 : vector<16x8xf32>
    %cst_25 = arith.constant dense<0.000000e+00> : vector<16xf32>
    %35 = vector.multi_reduction <add>, %34, %cst_25 [1] : vector<16x8xf32> to vector<16xf32>
    %36 = vector.shape_cast %35 : vector<16xf32> to vector<16x1xf32>
    %37 = tpu.reciprocal %36 {approx = true} : vector<16x1xf32> -> vector<16x1xf32>
    %38 = vector.broadcast %37 : vector<16x1xf32> to vector<16x8xf32>
    %39 = arith.mulf %34, %38 : vector<16x8xf32>
    %40 = arith.truncf %39 : vector<16x8xf32> to vector<16x8xbf16>
    %cst_26 = arith.constant dense<0.000000e+00> : vector<16x8xf32>
    %41 = tpu.matmul %40, %28, %cst_26 {dimension_numbers = #tpu.dot_dimension_numbers<[1], [0], [0], [1], [0, 0, 1, 1], [], []>} : vector<16x8xbf16>, vector<8x8xbf16>, vector<16x8xf32> -> vector<16x8xf32>
    %42 = arith.truncf %41 : vector<16x8xf32> to vector<16x8xbf16>
    %43 = vector.extract_strided_slice %8 {offsets = [0, 0], sizes = [8, 32], strides = [1, 1]} : vector<32x32xbf16> to vector<8x32xbf16>
    %cst_27 = arith.constant dense<0.000000e+00> : vector<16x32xf32>
    %44 = tpu.matmul %42, %43, %cst_27 {dimension_numbers = #tpu.dot_dimension_numbers<[1], [0], [0], [1], [0, 0, 1, 1], [], []>} : vector<16x8xbf16>, vector<8x32xbf16>, vector<16x32xf32> -> vector<16x32xf32>
    %45 = arith.addf %25, %44 : vector<16x32xf32>
    %46 = vector.extract_strided_slice %20 {offsets = [0, 8], sizes = [16, 8], strides = [1, 1]} : vector<16x32xbf16> to vector<16x8xbf16>
    %47 = vector.extract_strided_slice %22 {offsets = [0, 8], sizes = [8, 8], strides = [1, 1]} : vector<8x32xbf16> to vector<8x8xbf16>
    %48 = vector.extract_strided_slice %24 {offsets = [0, 8], sizes = [8, 8], strides = [1, 1]} : vector<8x32xbf16> to vector<8x8xbf16>
    %cst_28 = arith.constant dense<0.000000e+00> : vector<16x8xf32>
    %49 = tpu.matmul %46, %47, %cst_28 {dimension_numbers = #tpu.dot_dimension_numbers<[1], [1], [0], [0], [0, 0, 1, 0], [], []>} : vector<16x8xbf16>, vector<8x8xbf16>, vector<16x8xf32> -> vector<16x8xf32>
    %cst_29 = arith.constant dense<0xFF800000> : vector<16xf32>
    %50 = vector.multi_reduction <maximumf>, %49, %cst_29 [1] : vector<16x8xf32> to vector<16xf32>
    %51 = vector.shape_cast %50 : vector<16xf32> to vector<16x1xf32>
    %52 = vector.broadcast %51 : vector<16x1xf32> to vector<16x8xf32>
    %53 = arith.subf %49, %52 : vector<16x8xf32>
    %54 = math.exp %53 : vector<16x8xf32>
    %cst_30 = arith.constant dense<0.000000e+00> : vector<16xf32>
    %55 = vector.multi_reduction <add>, %54, %cst_30 [1] : vector<16x8xf32> to vector<16xf32>
    %56 = vector.shape_cast %55 : vector<16xf32> to vector<16x1xf32>
    %57 = tpu.reciprocal %56 {approx = true} : vector<16x1xf32> -> vector<16x1xf32>
    %58 = vector.broadcast %57 : vector<16x1xf32> to vector<16x8xf32>
    %59 = arith.mulf %54, %58 : vector<16x8xf32>
    %60 = arith.truncf %59 : vector<16x8xf32> to vector<16x8xbf16>
    %cst_31 = arith.constant dense<0.000000e+00> : vector<16x8xf32>
    %61 = tpu.matmul %60, %48, %cst_31 {dimension_numbers = #tpu.dot_dimension_numbers<[1], [0], [0], [1], [0, 0, 1, 1], [], []>} : vector<16x8xbf16>, vector<8x8xbf16>, vector<16x8xf32> -> vector<16x8xf32>
    %62 = arith.truncf %61 : vector<16x8xf32> to vector<16x8xbf16>
    %63 = vector.extract_strided_slice %8 {offsets = [8, 0], sizes = [8, 32], strides = [1, 1]} : vector<32x32xbf16> to vector<8x32xbf16>
    %cst_32 = arith.constant dense<0.000000e+00> : vector<16x32xf32>
    %64 = tpu.matmul %62, %63, %cst_32 {dimension_numbers = #tpu.dot_dimension_numbers<[1], [0], [0], [1], [0, 0, 1, 1], [], []>} : vector<16x8xbf16>, vector<8x32xbf16>, vector<16x32xf32> -> vector<16x32xf32>
    %65 = arith.addf %45, %64 : vector<16x32xf32>
    %66 = vector.extract_strided_slice %20 {offsets = [0, 16], sizes = [16, 8], strides = [1, 1]} : vector<16x32xbf16> to vector<16x8xbf16>
    %67 = vector.extract_strided_slice %22 {offsets = [0, 16], sizes = [8, 8], strides = [1, 1]} : vector<8x32xbf16> to vector<8x8xbf16>
    %68 = vector.extract_strided_slice %24 {offsets = [0, 16], sizes = [8, 8], strides = [1, 1]} : vector<8x32xbf16> to vector<8x8xbf16>
    %cst_33 = arith.constant dense<0.000000e+00> : vector<16x8xf32>
    %69 = tpu.matmul %66, %67, %cst_33 {dimension_numbers = #tpu.dot_dimension_numbers<[1], [1], [0], [0], [0, 0, 1, 0], [], []>} : vector<16x8xbf16>, vector<8x8xbf16>, vector<16x8xf32> -> vector<16x8xf32>
    %cst_34 = arith.constant dense<0xFF800000> : vector<16xf32>
    %70 = vector.multi_reduction <maximumf>, %69, %cst_34 [1] : vector<16x8xf32> to vector<16xf32>
    %71 = vector.shape_cast %70 : vector<16xf32> to vector<16x1xf32>
    %72 = vector.broadcast %71 : vector<16x1xf32> to vector<16x8xf32>
    %73 = arith.subf %69, %72 : vector<16x8xf32>
    %74 = math.exp %73 : vector<16x8xf32>
    %cst_35 = arith.constant dense<0.000000e+00> : vector<16xf32>
    %75 = vector.multi_reduction <add>, %74, %cst_35 [1] : vector<16x8xf32> to vector<16xf32>
    %76 = vector.shape_cast %75 : vector<16xf32> to vector<16x1xf32>
    %77 = tpu.reciprocal %76 {approx = true} : vector<16x1xf32> -> vector<16x1xf32>
    %78 = vector.broadcast %77 : vector<16x1xf32> to vector<16x8xf32>
    %79 = arith.mulf %74, %78 : vector<16x8xf32>
    %80 = arith.truncf %79 : vector<16x8xf32> to vector<16x8xbf16>
    %cst_36 = arith.constant dense<0.000000e+00> : vector<16x8xf32>
    %81 = tpu.matmul %80, %68, %cst_36 {dimension_numbers = #tpu.dot_dimension_numbers<[1], [0], [0], [1], [0, 0, 1, 1], [], []>} : vector<16x8xbf16>, vector<8x8xbf16>, vector<16x8xf32> -> vector<16x8xf32>
    %82 = arith.truncf %81 : vector<16x8xf32> to vector<16x8xbf16>
    %83 = vector.extract_strided_slice %8 {offsets = [16, 0], sizes = [8, 32], strides = [1, 1]} : vector<32x32xbf16> to vector<8x32xbf16>
    %cst_37 = arith.constant dense<0.000000e+00> : vector<16x32xf32>
    %84 = tpu.matmul %82, %83, %cst_37 {dimension_numbers = #tpu.dot_dimension_numbers<[1], [0], [0], [1], [0, 0, 1, 1], [], []>} : vector<16x8xbf16>, vector<8x32xbf16>, vector<16x32xf32> -> vector<16x32xf32>
    %85 = arith.addf %65, %84 : vector<16x32xf32>
    %86 = vector.extract_strided_slice %20 {offsets = [0, 24], sizes = [16, 8], strides = [1, 1]} : vector<16x32xbf16> to vector<16x8xbf16>
    %87 = vector.extract_strided_slice %22 {offsets = [0, 24], sizes = [8, 8], strides = [1, 1]} : vector<8x32xbf16> to vector<8x8xbf16>
    %88 = vector.extract_strided_slice %24 {offsets = [0, 24], sizes = [8, 8], strides = [1, 1]} : vector<8x32xbf16> to vector<8x8xbf16>
    %cst_38 = arith.constant dense<0.000000e+00> : vector<16x8xf32>
    %89 = tpu.matmul %86, %87, %cst_38 {dimension_numbers = #tpu.dot_dimension_numbers<[1], [1], [0], [0], [0, 0, 1, 0], [], []>} : vector<16x8xbf16>, vector<8x8xbf16>, vector<16x8xf32> -> vector<16x8xf32>
    %cst_39 = arith.constant dense<0xFF800000> : vector<16xf32>
    %90 = vector.multi_reduction <maximumf>, %89, %cst_39 [1] : vector<16x8xf32> to vector<16xf32>
    %91 = vector.shape_cast %90 : vector<16xf32> to vector<16x1xf32>
    %92 = vector.broadcast %91 : vector<16x1xf32> to vector<16x8xf32>
    %93 = arith.subf %89, %92 : vector<16x8xf32>
    %94 = math.exp %93 : vector<16x8xf32>
    %cst_40 = arith.constant dense<0.000000e+00> : vector<16xf32>
    %95 = vector.multi_reduction <add>, %94, %cst_40 [1] : vector<16x8xf32> to vector<16xf32>
    %96 = vector.shape_cast %95 : vector<16xf32> to vector<16x1xf32>
    %97 = tpu.reciprocal %96 {approx = true} : vector<16x1xf32> -> vector<16x1xf32>
    %98 = vector.broadcast %97 : vector<16x1xf32> to vector<16x8xf32>
    %99 = arith.mulf %94, %98 : vector<16x8xf32>
    %100 = arith.truncf %99 : vector<16x8xf32> to vector<16x8xbf16>
    %cst_41 = arith.constant dense<0.000000e+00> : vector<16x8xf32>
    %101 = tpu.matmul %100, %88, %cst_41 {dimension_numbers = #tpu.dot_dimension_numbers<[1], [0], [0], [1], [0, 0, 1, 1], [], []>} : vector<16x8xbf16>, vector<8x8xbf16>, vector<16x8xf32> -> vector<16x8xf32>
    %102 = arith.truncf %101 : vector<16x8xf32> to vector<16x8xbf16>
    %103 = vector.extract_strided_slice %8 {offsets = [24, 0], sizes = [8, 32], strides = [1, 1]} : vector<32x32xbf16> to vector<8x32xbf16>
    %cst_42 = arith.constant dense<0.000000e+00> : vector<16x32xf32>
    %104 = tpu.matmul %102, %103, %cst_42 {dimension_numbers = #tpu.dot_dimension_numbers<[1], [0], [0], [1], [0, 0, 1, 1], [], []>} : vector<16x8xbf16>, vector<8x32xbf16>, vector<16x32xf32> -> vector<16x32xf32>
    %105 = arith.addf %85, %104 : vector<16x32xf32>
    %106 = vector.broadcast %9 : vector<1x32xf32> to vector<16x32xf32>
    %107 = arith.addf %105, %106 : vector<16x32xf32>
    %108 = arith.addf %107, %1 : vector<16x32xf32>
    %cst_43 = arith.constant dense<0.000000e+00> : vector<16xf32>
    %109 = vector.multi_reduction <add>, %108, %cst_43 [1] : vector<16x32xf32> to vector<16xf32>
    %110 = vector.shape_cast %109 : vector<16xf32> to vector<16x1xf32>
    %cst_44 = arith.constant 3.200000e+01 : f32
    %111 = vector.broadcast %cst_44 : f32 to vector<16x1xf32>
    %112 = arith.divf %110, %111 : vector<16x1xf32>
    %113 = vector.broadcast %112 : vector<16x1xf32> to vector<16x32xf32>
    %114 = arith.subf %108, %113 : vector<16x32xf32>
    %115 = arith.mulf %114, %114 : vector<16x32xf32>
    %cst_45 = arith.constant dense<0.000000e+00> : vector<16xf32>
    %116 = vector.multi_reduction <add>, %115, %cst_45 [1] : vector<16x32xf32> to vector<16xf32>
    %117 = vector.shape_cast %116 : vector<16xf32> to vector<16x1xf32>
    %cst_46 = arith.constant 3.200000e+01 : f32
    %118 = vector.broadcast %cst_46 : f32 to vector<16x1xf32>
    %119 = arith.divf %117, %118 : vector<16x1xf32>
    %120 = vector.broadcast %112 : vector<16x1xf32> to vector<16x32xf32>
    %121 = arith.subf %108, %120 : vector<16x32xf32>
    %cst_47 = arith.constant 9.99999974E-6 : f32
    %122 = vector.broadcast %cst_47 : f32 to vector<16x1xf32>
    %123 = arith.addf %119, %122 : vector<16x1xf32>
    %124 = math.rsqrt %123 : vector<16x1xf32>
    %125 = vector.broadcast %124 : vector<16x1xf32> to vector<16x32xf32>
    %126 = arith.mulf %121, %125 : vector<16x32xf32>
    %127 = vector.broadcast %10 : vector<1x32xf32> to vector<16x32xf32>
    %128 = arith.mulf %126, %127 : vector<16x32xf32>
    %129 = vector.broadcast %11 : vector<1x32xf32> to vector<16x32xf32>
    %130 = arith.addf %128, %129 : vector<16x32xf32>
    %c0_48 = arith.constant 0 : index
    %c0_49 = arith.constant 0 : index
    %131 = vector.load %arg11[%c0_48, %c0_49] : memref<64x64xbf16, #tpu.memory_space<vmem>>, vector<64x64xbf16>
    %c0_50 = arith.constant 0 : index
    %c0_51 = arith.constant 0 : index
    %132 = vector.load %arg12[%c0_50, %c0_51] : memref<1x64xf32, #tpu.memory_space<vmem>>, vector<1x64xf32>
    %c0_52 = arith.constant 0 : index
    %c0_53 = arith.constant 0 : index
    %133 = vector.load %arg13[%c0_52, %c0_53] : memref<32x128xbf16, #tpu.memory_space<vmem>>, vector<32x128xbf16>
    %c0_54 = arith.constant 0 : index
    %c0_55 = arith.constant 0 : index
    %134 = vector.load %arg14[%c0_54, %c0_55] : memref<1x128xf32, #tpu.memory_space<vmem>>, vector<1x128xf32>
    %c0_56 = arith.constant 0 : index
    %c0_57 = arith.constant 0 : index
    %135 = vector.load %arg15[%c0_56, %c0_57] : memref<64x64xbf16, #tpu.memory_space<vmem>>, vector<64x64xbf16>
    %c0_58 = arith.constant 0 : index
    %c0_59 = arith.constant 0 : index
    %136 = vector.load %arg16[%c0_58, %c0_59] : memref<1x64xf32, #tpu.memory_space<vmem>>, vector<1x64xf32>
    %c0_60 = arith.constant 0 : index
    %c0_61 = arith.constant 0 : index
    %137 = vector.load %arg17[%c0_60, %c0_61] : memref<1x64xf32, #tpu.memory_space<vmem>>, vector<1x64xf32>
    %c0_62 = arith.constant 0 : index
    %c0_63 = arith.constant 0 : index
    %138 = vector.load %arg18[%c0_62, %c0_63] : memref<1x64xf32, #tpu.memory_space<vmem>>, vector<1x64xf32>
    %139 = arith.truncf %3 : vector<8x64xf32> to vector<8x64xbf16>
    %140 = arith.truncf %1 : vector<16x32xf32> to vector<16x32xbf16>
    %cst_64 = arith.constant dense<0.000000e+00> : vector<8x64xf32>
    %141 = tpu.matmul %139, %131, %cst_64 {dimension_numbers = #tpu.dot_dimension_numbers<[1], [0], [0], [1], [0, 0, 1, 1], [], []>} : vector<8x64xbf16>, vector<64x64xbf16>, vector<8x64xf32> -> vector<8x64xf32>
    %142 = vector.broadcast %132 : vector<1x64xf32> to vector<8x64xf32>
    %143 = arith.addf %141, %142 : vector<8x64xf32>
    %cst_65 = arith.constant dense<0.000000e+00> : vector<16x128xf32>
    %144 = tpu.matmul %140, %133, %cst_65 {dimension_numbers = #tpu.dot_dimension_numbers<[1], [0], [0], [1], [0, 0, 1, 1], [], []>} : vector<16x32xbf16>, vector<32x128xbf16>, vector<16x128xf32> -> vector<16x128xf32>
    %145 = vector.broadcast %134 : vector<1x128xf32> to vector<16x128xf32>
    %146 = arith.addf %144, %145 : vector<16x128xf32>
    %147 = arith.truncf %143 : vector<8x64xf32> to vector<8x64xbf16>
    %148 = vector.extract_strided_slice %146 {offsets = [0, 0], sizes = [16, 64], strides = [1, 1]} : vector<16x128xf32> to vector<16x64xf32>
    %149 = arith.truncf %148 : vector<16x64xf32> to vector<16x64xbf16>
    %150 = vector.extract_strided_slice %146 {offsets = [0, 64], sizes = [16, 64], strides = [1, 1]} : vector<16x128xf32> to vector<16x64xf32>
    %151 = arith.truncf %150 : vector<16x64xf32> to vector<16x64xbf16>
    %cst_66 = arith.constant 0.000000e+00 : f32
    %152 = vector.broadcast %cst_66 : f32 to vector<8x64xf32>
    %153 = vector.extract_strided_slice %147 {offsets = [0, 0], sizes = [8, 16], strides = [1, 1]} : vector<8x64xbf16> to vector<8x16xbf16>
    %154 = vector.extract_strided_slice %149 {offsets = [0, 0], sizes = [16, 16], strides = [1, 1]} : vector<16x64xbf16> to vector<16x16xbf16>
    %155 = vector.extract_strided_slice %151 {offsets = [0, 0], sizes = [16, 16], strides = [1, 1]} : vector<16x64xbf16> to vector<16x16xbf16>
    %cst_67 = arith.constant dense<0.000000e+00> : vector<8x16xf32>
    %156 = tpu.matmul %153, %154, %cst_67 {dimension_numbers = #tpu.dot_dimension_numbers<[1], [1], [0], [0], [0, 0, 1, 0], [], []>} : vector<8x16xbf16>, vector<16x16xbf16>, vector<8x16xf32> -> vector<8x16xf32>
    %cst_68 = arith.constant dense<0xFF800000> : vector<8xf32>
    %157 = vector.multi_reduction <maximumf>, %156, %cst_68 [1] : vector<8x16xf32> to vector<8xf32>
    %158 = vector.shape_cast %157 : vector<8xf32> to vector<8x1xf32>
    %159 = vector.broadcast %158 : vector<8x1xf32> to vector<8x16xf32>
    %160 = arith.subf %156, %159 : vector<8x16xf32>
    %161 = math.exp %160 : vector<8x16xf32>
    %cst_69 = arith.constant dense<0.000000e+00> : vector<8xf32>
    %162 = vector.multi_reduction <add>, %161, %cst_69 [1] : vector<8x16xf32> to vector<8xf32>
    %163 = vector.shape_cast %162 : vector<8xf32> to vector<8x1xf32>
    %164 = tpu.reciprocal %163 {approx = true} : vector<8x1xf32> -> vector<8x1xf32>
    %165 = vector.broadcast %164 : vector<8x1xf32> to vector<8x16xf32>
    %166 = arith.mulf %161, %165 : vector<8x16xf32>
    %167 = arith.truncf %166 : vector<8x16xf32> to vector<8x16xbf16>
    %cst_70 = arith.constant dense<0.000000e+00> : vector<8x16xf32>
    %168 = tpu.matmul %167, %155, %cst_70 {dimension_numbers = #tpu.dot_dimension_numbers<[1], [0], [0], [1], [0, 0, 1, 1], [], []>} : vector<8x16xbf16>, vector<16x16xbf16>, vector<8x16xf32> -> vector<8x16xf32>
    %169 = arith.truncf %168 : vector<8x16xf32> to vector<8x16xbf16>
    %170 = vector.extract_strided_slice %135 {offsets = [0, 0], sizes = [16, 64], strides = [1, 1]} : vector<64x64xbf16> to vector<16x64xbf16>
    %cst_71 = arith.constant dense<0.000000e+00> : vector<8x64xf32>
    %171 = tpu.matmul %169, %170, %cst_71 {dimension_numbers = #tpu.dot_dimension_numbers<[1], [0], [0], [1], [0, 0, 1, 1], [], []>} : vector<8x16xbf16>, vector<16x64xbf16>, vector<8x64xf32> -> vector<8x64xf32>
    %172 = arith.addf %152, %171 : vector<8x64xf32>
    %173 = vector.extract_strided_slice %147 {offsets = [0, 16], sizes = [8, 16], strides = [1, 1]} : vector<8x64xbf16> to vector<8x16xbf16>
    %174 = vector.extract_strided_slice %149 {offsets = [0, 16], sizes = [16, 16], strides = [1, 1]} : vector<16x64xbf16> to vector<16x16xbf16>
    %175 = vector.extract_strided_slice %151 {offsets = [0, 16], sizes = [16, 16], strides = [1, 1]} : vector<16x64xbf16> to vector<16x16xbf16>
    %cst_72 = arith.constant dense<0.000000e+00> : vector<8x16xf32>
    %176 = tpu.matmul %173, %174, %cst_72 {dimension_numbers = #tpu.dot_dimension_numbers<[1], [1], [0], [0], [0, 0, 1, 0], [], []>} : vector<8x16xbf16>, vector<16x16xbf16>, vector<8x16xf32> -> vector<8x16xf32>
    %cst_73 = arith.constant dense<0xFF800000> : vector<8xf32>
    %177 = vector.multi_reduction <maximumf>, %176, %cst_73 [1] : vector<8x16xf32> to vector<8xf32>
    %178 = vector.shape_cast %177 : vector<8xf32> to vector<8x1xf32>
    %179 = vector.broadcast %178 : vector<8x1xf32> to vector<8x16xf32>
    %180 = arith.subf %176, %179 : vector<8x16xf32>
    %181 = math.exp %180 : vector<8x16xf32>
    %cst_74 = arith.constant dense<0.000000e+00> : vector<8xf32>
    %182 = vector.multi_reduction <add>, %181, %cst_74 [1] : vector<8x16xf32> to vector<8xf32>
    %183 = vector.shape_cast %182 : vector<8xf32> to vector<8x1xf32>
    %184 = tpu.reciprocal %183 {approx = true} : vector<8x1xf32> -> vector<8x1xf32>
    %185 = vector.broadcast %184 : vector<8x1xf32> to vector<8x16xf32>
    %186 = arith.mulf %181, %185 : vector<8x16xf32>
    %187 = arith.truncf %186 : vector<8x16xf32> to vector<8x16xbf16>
    %cst_75 = arith.constant dense<0.000000e+00> : vector<8x16xf32>
    %188 = tpu.matmul %187, %175, %cst_75 {dimension_numbers = #tpu.dot_dimension_numbers<[1], [0], [0], [1], [0, 0, 1, 1], [], []>} : vector<8x16xbf16>, vector<16x16xbf16>, vector<8x16xf32> -> vector<8x16xf32>
    %189 = arith.truncf %188 : vector<8x16xf32> to vector<8x16xbf16>
    %190 = vector.extract_strided_slice %135 {offsets = [16, 0], sizes = [16, 64], strides = [1, 1]} : vector<64x64xbf16> to vector<16x64xbf16>
    %cst_76 = arith.constant dense<0.000000e+00> : vector<8x64xf32>
    %191 = tpu.matmul %189, %190, %cst_76 {dimension_numbers = #tpu.dot_dimension_numbers<[1], [0], [0], [1], [0, 0, 1, 1], [], []>} : vector<8x16xbf16>, vector<16x64xbf16>, vector<8x64xf32> -> vector<8x64xf32>
    %192 = arith.addf %172, %191 : vector<8x64xf32>
    %193 = vector.extract_strided_slice %147 {offsets = [0, 32], sizes = [8, 16], strides = [1, 1]} : vector<8x64xbf16> to vector<8x16xbf16>
    %194 = vector.extract_strided_slice %149 {offsets = [0, 32], sizes = [16, 16], strides = [1, 1]} : vector<16x64xbf16> to vector<16x16xbf16>
    %195 = vector.extract_strided_slice %151 {offsets = [0, 32], sizes = [16, 16], strides = [1, 1]} : vector<16x64xbf16> to vector<16x16xbf16>
    %cst_77 = arith.constant dense<0.000000e+00> : vector<8x16xf32>
    %196 = tpu.matmul %193, %194, %cst_77 {dimension_numbers = #tpu.dot_dimension_numbers<[1], [1], [0], [0], [0, 0, 1, 0], [], []>} : vector<8x16xbf16>, vector<16x16xbf16>, vector<8x16xf32> -> vector<8x16xf32>
    %cst_78 = arith.constant dense<0xFF800000> : vector<8xf32>
    %197 = vector.multi_reduction <maximumf>, %196, %cst_78 [1] : vector<8x16xf32> to vector<8xf32>
    %198 = vector.shape_cast %197 : vector<8xf32> to vector<8x1xf32>
    %199 = vector.broadcast %198 : vector<8x1xf32> to vector<8x16xf32>
    %200 = arith.subf %196, %199 : vector<8x16xf32>
    %201 = math.exp %200 : vector<8x16xf32>
    %cst_79 = arith.constant dense<0.000000e+00> : vector<8xf32>
    %202 = vector.multi_reduction <add>, %201, %cst_79 [1] : vector<8x16xf32> to vector<8xf32>
    %203 = vector.shape_cast %202 : vector<8xf32> to vector<8x1xf32>
    %204 = tpu.reciprocal %203 {approx = true} : vector<8x1xf32> -> vector<8x1xf32>
    %205 = vector.broadcast %204 : vector<8x1xf32> to vector<8x16xf32>
    %206 = arith.mulf %201, %205 : vector<8x16xf32>
    %207 = arith.truncf %206 : vector<8x16xf32> to vector<8x16xbf16>
    %cst_80 = arith.constant dense<0.000000e+00> : vector<8x16xf32>
    %208 = tpu.matmul %207, %195, %cst_80 {dimension_numbers = #tpu.dot_dimension_numbers<[1], [0], [0], [1], [0, 0, 1, 1], [], []>} : vector<8x16xbf16>, vector<16x16xbf16>, vector<8x16xf32> -> vector<8x16xf32>
    %209 = arith.truncf %208 : vector<8x16xf32> to vector<8x16xbf16>
    %210 = vector.extract_strided_slice %135 {offsets = [32, 0], sizes = [16, 64], strides = [1, 1]} : vector<64x64xbf16> to vector<16x64xbf16>
    %cst_81 = arith.constant dense<0.000000e+00> : vector<8x64xf32>
    %211 = tpu.matmul %209, %210, %cst_81 {dimension_numbers = #tpu.dot_dimension_numbers<[1], [0], [0], [1], [0, 0, 1, 1], [], []>} : vector<8x16xbf16>, vector<16x64xbf16>, vector<8x64xf32> -> vector<8x64xf32>
    %212 = arith.addf %192, %211 : vector<8x64xf32>
    %213 = vector.extract_strided_slice %147 {offsets = [0, 48], sizes = [8, 16], strides = [1, 1]} : vector<8x64xbf16> to vector<8x16xbf16>
    %214 = vector.extract_strided_slice %149 {offsets = [0, 48], sizes = [16, 16], strides = [1, 1]} : vector<16x64xbf16> to vector<16x16xbf16>
    %215 = vector.extract_strided_slice %151 {offsets = [0, 48], sizes = [16, 16], strides = [1, 1]} : vector<16x64xbf16> to vector<16x16xbf16>
    %cst_82 = arith.constant dense<0.000000e+00> : vector<8x16xf32>
    %216 = tpu.matmul %213, %214, %cst_82 {dimension_numbers = #tpu.dot_dimension_numbers<[1], [1], [0], [0], [0, 0, 1, 0], [], []>} : vector<8x16xbf16>, vector<16x16xbf16>, vector<8x16xf32> -> vector<8x16xf32>
    %cst_83 = arith.constant dense<0xFF800000> : vector<8xf32>
    %217 = vector.multi_reduction <maximumf>, %216, %cst_83 [1] : vector<8x16xf32> to vector<8xf32>
    %218 = vector.shape_cast %217 : vector<8xf32> to vector<8x1xf32>
    %219 = vector.broadcast %218 : vector<8x1xf32> to vector<8x16xf32>
    %220 = arith.subf %216, %219 : vector<8x16xf32>
    %221 = math.exp %220 : vector<8x16xf32>
    %cst_84 = arith.constant dense<0.000000e+00> : vector<8xf32>
    %222 = vector.multi_reduction <add>, %221, %cst_84 [1] : vector<8x16xf32> to vector<8xf32>
    %223 = vector.shape_cast %222 : vector<8xf32> to vector<8x1xf32>
    %224 = tpu.reciprocal %223 {approx = true} : vector<8x1xf32> -> vector<8x1xf32>
    %225 = vector.broadcast %224 : vector<8x1xf32> to vector<8x16xf32>
    %226 = arith.mulf %221, %225 : vector<8x16xf32>
    %227 = arith.truncf %226 : vector<8x16xf32> to vector<8x16xbf16>
    %cst_85 = arith.constant dense<0.000000e+00> : vector<8x16xf32>
    %228 = tpu.matmul %227, %215, %cst_85 {dimension_numbers = #tpu.dot_dimension_numbers<[1], [0], [0], [1], [0, 0, 1, 1], [], []>} : vector<8x16xbf16>, vector<16x16xbf16>, vector<8x16xf32> -> vector<8x16xf32>
    %229 = arith.truncf %228 : vector<8x16xf32> to vector<8x16xbf16>
    %230 = vector.extract_strided_slice %135 {offsets = [48, 0], sizes = [16, 64], strides = [1, 1]} : vector<64x64xbf16> to vector<16x64xbf16>
    %cst_86 = arith.constant dense<0.000000e+00> : vector<8x64xf32>
    %231 = tpu.matmul %229, %230, %cst_86 {dimension_numbers = #tpu.dot_dimension_numbers<[1], [0], [0], [1], [0, 0, 1, 1], [], []>} : vector<8x16xbf16>, vector<16x64xbf16>, vector<8x64xf32> -> vector<8x64xf32>
    %232 = arith.addf %212, %231 : vector<8x64xf32>
    %233 = vector.broadcast %136 : vector<1x64xf32> to vector<8x64xf32>
    %234 = arith.addf %232, %233 : vector<8x64xf32>
    %235 = arith.addf %234, %3 : vector<8x64xf32>
    %cst_87 = arith.constant dense<0.000000e+00> : vector<8xf32>
    %236 = vector.multi_reduction <add>, %235, %cst_87 [1] : vector<8x64xf32> to vector<8xf32>
    %237 = vector.shape_cast %236 : vector<8xf32> to vector<8x1xf32>
    %cst_88 = arith.constant 6.400000e+01 : f32
    %238 = vector.broadcast %cst_88 : f32 to vector<8x1xf32>
    %239 = arith.divf %237, %238 : vector<8x1xf32>
    %240 = vector.broadcast %239 : vector<8x1xf32> to vector<8x64xf32>
    %241 = arith.subf %235, %240 : vector<8x64xf32>
    %242 = arith.mulf %241, %241 : vector<8x64xf32>
    %cst_89 = arith.constant dense<0.000000e+00> : vector<8xf32>
    %243 = vector.multi_reduction <add>, %242, %cst_89 [1] : vector<8x64xf32> to vector<8xf32>
    %244 = vector.shape_cast %243 : vector<8xf32> to vector<8x1xf32>
    %cst_90 = arith.constant 6.400000e+01 : f32
    %245 = vector.broadcast %cst_90 : f32 to vector<8x1xf32>
    %246 = arith.divf %244, %245 : vector<8x1xf32>
    %247 = vector.broadcast %239 : vector<8x1xf32> to vector<8x64xf32>
    %248 = arith.subf %235, %247 : vector<8x64xf32>
    %cst_91 = arith.constant 9.99999974E-6 : f32
    %249 = vector.broadcast %cst_91 : f32 to vector<8x1xf32>
    %250 = arith.addf %246, %249 : vector<8x1xf32>
    %251 = math.rsqrt %250 : vector<8x1xf32>
    %252 = vector.broadcast %251 : vector<8x1xf32> to vector<8x64xf32>
    %253 = arith.mulf %248, %252 : vector<8x64xf32>
    %254 = vector.broadcast %137 : vector<1x64xf32> to vector<8x64xf32>
    %255 = arith.mulf %253, %254 : vector<8x64xf32>
    %256 = vector.broadcast %138 : vector<1x64xf32> to vector<8x64xf32>
    %257 = arith.addf %255, %256 : vector<8x64xf32>
    %c0_92 = arith.constant 0 : index
    %c0_93 = arith.constant 0 : index
    %258 = vector.load %arg19[%c0_92, %c0_93] : memref<32x128xbf16, #tpu.memory_space<vmem>>, vector<32x128xbf16>
    %c0_94 = arith.constant 0 : index
    %c0_95 = arith.constant 0 : index
    %259 = vector.load %arg20[%c0_94, %c0_95] : memref<1x128xf32, #tpu.memory_space<vmem>>, vector<1x128xf32>
    %c0_96 = arith.constant 0 : index
    %c0_97 = arith.constant 0 : index
    %260 = vector.load %arg21[%c0_96, %c0_97] : memref<128x32xbf16, #tpu.memory_space<vmem>>, vector<128x32xbf16>
    %c0_98 = arith.constant 0 : index
    %c0_99 = arith.constant 0 : index
    %261 = vector.load %arg22[%c0_98, %c0_99] : memref<1x32xf32, #tpu.memory_space<vmem>>, vector<1x32xf32>
    %c0_100 = arith.constant 0 : index
    %c0_101 = arith.constant 0 : index
    %262 = vector.load %arg23[%c0_100, %c0_101] : memref<1x32xf32, #tpu.memory_space<vmem>>, vector<1x32xf32>
    %c0_102 = arith.constant 0 : index
    %c0_103 = arith.constant 0 : index
    %263 = vector.load %arg24[%c0_102, %c0_103] : memref<1x32xf32, #tpu.memory_space<vmem>>, vector<1x32xf32>
    %264 = arith.truncf %130 : vector<16x32xf32> to vector<16x32xbf16>
    %cst_104 = arith.constant dense<0.000000e+00> : vector<16x128xf32>
    %265 = tpu.matmul %264, %258, %cst_104 {dimension_numbers = #tpu.dot_dimension_numbers<[1], [0], [0], [1], [0, 0, 1, 1], [], []>} : vector<16x32xbf16>, vector<32x128xbf16>, vector<16x128xf32> -> vector<16x128xf32>
    %266 = vector.broadcast %259 : vector<1x128xf32> to vector<16x128xf32>
    %267 = arith.addf %265, %266 : vector<16x128xf32>
    %cst_105 = arith.constant 5.000000e-01 : f32
    %268 = vector.broadcast %cst_105 : f32 to vector<16x128xf32>
    %269 = arith.mulf %268, %267 : vector<16x128xf32>
    %cst_106 = arith.constant 4.471500e-02 : f32
    %270 = vector.broadcast %cst_106 : f32 to vector<16x128xf32>
    %271 = arith.mulf %270, %267 : vector<16x128xf32>
    %272 = arith.mulf %271, %267 : vector<16x128xf32>
    %273 = arith.mulf %272, %267 : vector<16x128xf32>
    %274 = arith.addf %267, %273 : vector<16x128xf32>
    %cst_107 = arith.constant 0.797884583 : f32
    %275 = vector.broadcast %cst_107 : f32 to vector<16x128xf32>
    %276 = arith.mulf %275, %274 : vector<16x128xf32>
    %277 = math.tanh %276 : vector<16x128xf32>
    %cst_108 = arith.constant 1.000000e+00 : f32
    %278 = vector.broadcast %cst_108 : f32 to vector<16x128xf32>
    %279 = arith.addf %278, %277 : vector<16x128xf32>
    %280 = arith.mulf %269, %279 : vector<16x128xf32>
    %281 = arith.truncf %280 : vector<16x128xf32> to vector<16x128xbf16>
    %cst_109 = arith.constant dense<0.000000e+00> : vector<16x32xf32>
    %282 = tpu.matmul %281, %260, %cst_109 {dimension_numbers = #tpu.dot_dimension_numbers<[1], [0], [0], [1], [0, 0, 1, 1], [], []>} : vector<16x128xbf16>, vector<128x32xbf16>, vector<16x32xf32> -> vector<16x32xf32>
    %283 = vector.broadcast %261 : vector<1x32xf32> to vector<16x32xf32>
    %284 = arith.addf %282, %283 : vector<16x32xf32>
    %285 = arith.addf %284, %130 : vector<16x32xf32>
    %cst_110 = arith.constant dense<0.000000e+00> : vector<16xf32>
    %286 = vector.multi_reduction <add>, %285, %cst_110 [1] : vector<16x32xf32> to vector<16xf32>
    %287 = vector.shape_cast %286 : vector<16xf32> to vector<16x1xf32>
    %cst_111 = arith.constant 3.200000e+01 : f32
    %288 = vector.broadcast %cst_111 : f32 to vector<16x1xf32>
    %289 = arith.divf %287, %288 : vector<16x1xf32>
    %290 = vector.broadcast %289 : vector<16x1xf32> to vector<16x32xf32>
    %291 = arith.subf %285, %290 : vector<16x32xf32>
    %292 = arith.mulf %291, %291 : vector<16x32xf32>
    %cst_112 = arith.constant dense<0.000000e+00> : vector<16xf32>
    %293 = vector.multi_reduction <add>, %292, %cst_112 [1] : vector<16x32xf32> to vector<16xf32>
    %294 = vector.shape_cast %293 : vector<16xf32> to vector<16x1xf32>
    %cst_113 = arith.constant 3.200000e+01 : f32
    %295 = vector.broadcast %cst_113 : f32 to vector<16x1xf32>
    %296 = arith.divf %294, %295 : vector<16x1xf32>
    %297 = vector.broadcast %289 : vector<16x1xf32> to vector<16x32xf32>
    %298 = arith.subf %285, %297 : vector<16x32xf32>
    %cst_114 = arith.constant 9.99999974E-6 : f32
    %299 = vector.broadcast %cst_114 : f32 to vector<16x1xf32>
    %300 = arith.addf %296, %299 : vector<16x1xf32>
    %301 = math.rsqrt %300 : vector<16x1xf32>
    %302 = vector.broadcast %301 : vector<16x1xf32> to vector<16x32xf32>
    %303 = arith.mulf %298, %302 : vector<16x32xf32>
    %304 = vector.broadcast %262 : vector<1x32xf32> to vector<16x32xf32>
    %305 = arith.mulf %303, %304 : vector<16x32xf32>
    %306 = vector.broadcast %263 : vector<1x32xf32> to vector<16x32xf32>
    %307 = arith.addf %305, %306 : vector<16x32xf32>
    %c0_115 = arith.constant 0 : index
    %c0_116 = arith.constant 0 : index
    %308 = vector.load %arg25[%c0_115, %c0_116] : memref<64x256xbf16, #tpu.memory_space<vmem>>, vector<64x256xbf16>
    %c0_117 = arith.constant 0 : index
    %c0_118 = arith.constant 0 : index
    %309 = vector.load %arg26[%c0_117, %c0_118] : memref<1x256xf32, #tpu.memory_space<vmem>>, vector<1x256xf32>
    %c0_119 = arith.constant 0 : index
    %c0_120 = arith.constant 0 : index
    %310 = vector.load %arg27[%c0_119, %c0_120] : memref<256x64xbf16, #tpu.memory_space<vmem>>, vector<256x64xbf16>
    %c0_121 = arith.constant 0 : index
    %c0_122 = arith.constant 0 : index
    %311 = vector.load %arg28[%c0_121, %c0_122] : memref<1x64xf32, #tpu.memory_space<vmem>>, vector<1x64xf32>
    %c0_123 = arith.constant 0 : index
    %c0_124 = arith.constant 0 : index
    %312 = vector.load %arg29[%c0_123, %c0_124] : memref<1x64xf32, #tpu.memory_space<vmem>>, vector<1x64xf32>
    %c0_125 = arith.constant 0 : index
    %c0_126 = arith.constant 0 : index
    %313 = vector.load %arg30[%c0_125, %c0_126] : memref<1x64xf32, #tpu.memory_space<vmem>>, vector<1x64xf32>
    %314 = arith.truncf %257 : vector<8x64xf32> to vector<8x64xbf16>
    %cst_127 = arith.constant dense<0.000000e+00> : vector<8x256xf32>
    %315 = tpu.matmul %314, %308, %cst_127 {dimension_numbers = #tpu.dot_dimension_numbers<[1], [0], [0], [1], [0, 0, 1, 1], [], []>} : vector<8x64xbf16>, vector<64x256xbf16>, vector<8x256xf32> -> vector<8x256xf32>
    %316 = vector.broadcast %309 : vector<1x256xf32> to vector<8x256xf32>
    %317 = arith.addf %315, %316 : vector<8x256xf32>
    %cst_128 = arith.constant 5.000000e-01 : f32
    %318 = vector.broadcast %cst_128 : f32 to vector<8x256xf32>
    %319 = arith.mulf %318, %317 : vector<8x256xf32>
    %cst_129 = arith.constant 4.471500e-02 : f32
    %320 = vector.broadcast %cst_129 : f32 to vector<8x256xf32>
    %321 = arith.mulf %320, %317 : vector<8x256xf32>
    %322 = arith.mulf %321, %317 : vector<8x256xf32>
    %323 = arith.mulf %322, %317 : vector<8x256xf32>
    %324 = arith.addf %317, %323 : vector<8x256xf32>
    %cst_130 = arith.constant 0.797884583 : f32
    %325 = vector.broadcast %cst_130 : f32 to vector<8x256xf32>
    %326 = arith.mulf %325, %324 : vector<8x256xf32>
    %327 = math.tanh %326 : vector<8x256xf32>
    %cst_131 = arith.constant 1.000000e+00 : f32
    %328 = vector.broadcast %cst_131 : f32 to vector<8x256xf32>
    %329 = arith.addf %328, %327 : vector<8x256xf32>
    %330 = arith.mulf %319, %329 : vector<8x256xf32>
    %331 = arith.truncf %330 : vector<8x256xf32> to vector<8x256xbf16>
    %cst_132 = arith.constant dense<0.000000e+00> : vector<8x64xf32>
    %332 = tpu.matmul %331, %310, %cst_132 {dimension_numbers = #tpu.dot_dimension_numbers<[1], [0], [0], [1], [0, 0, 1, 1], [], []>} : vector<8x256xbf16>, vector<256x64xbf16>, vector<8x64xf32> -> vector<8x64xf32>
    %333 = vector.broadcast %311 : vector<1x64xf32> to vector<8x64xf32>
    %334 = arith.addf %332, %333 : vector<8x64xf32>
    %335 = arith.addf %334, %257 : vector<8x64xf32>
    %cst_133 = arith.constant dense<0.000000e+00> : vector<8xf32>
    %336 = vector.multi_reduction <add>, %335, %cst_133 [1] : vector<8x64xf32> to vector<8xf32>
    %337 = vector.shape_cast %336 : vector<8xf32> to vector<8x1xf32>
    %cst_134 = arith.constant 6.400000e+01 : f32
    %338 = vector.broadcast %cst_134 : f32 to vector<8x1xf32>
    %339 = arith.divf %337, %338 : vector<8x1xf32>
    %340 = vector.broadcast %339 : vector<8x1xf32> to vector<8x64xf32>
    %341 = arith.subf %335, %340 : vector<8x64xf32>
    %342 = arith.mulf %341, %341 : vector<8x64xf32>
    %cst_135 = arith.constant dense<0.000000e+00> : vector<8xf32>
    %343 = vector.multi_reduction <add>, %342, %cst_135 [1] : vector<8x64xf32> to vector<8xf32>
    %344 = vector.shape_cast %343 : vector<8xf32> to vector<8x1xf32>
    %cst_136 = arith.constant 6.400000e+01 : f32
    %345 = vector.broadcast %cst_136 : f32 to vector<8x1xf32>
    %346 = arith.divf %344, %345 : vector<8x1xf32>
    %347 = vector.broadcast %339 : vector<8x1xf32> to vector<8x64xf32>
    %348 = arith.subf %335, %347 : vector<8x64xf32>
    %cst_137 = arith.constant 9.99999974E-6 : f32
    %349 = vector.broadcast %cst_137 : f32 to vector<8x1xf32>
    %350 = arith.addf %346, %349 : vector<8x1xf32>
    %351 = math.rsqrt %350 : vector<8x1xf32>
    %352 = vector.broadcast %351 : vector<8x1xf32> to vector<8x64xf32>
    %353 = arith.mulf %348, %352 : vector<8x64xf32>
    %354 = vector.broadcast %312 : vector<1x64xf32> to vector<8x64xf32>
    %355 = arith.mulf %353, %354 : vector<8x64xf32>
    %356 = vector.broadcast %313 : vector<1x64xf32> to vector<8x64xf32>
    %357 = arith.addf %355, %356 : vector<8x64xf32>
    %c0_138 = arith.constant 0 : index
    %c0_139 = arith.constant 0 : index
    %c0_140 = arith.constant 0 : index
    %358 = vector.load %arg31[%c0_138, %c0_139, %c0_140] : memref<1x16x32xf32, #tpu.memory_space<vmem>>, vector<1x16x32xf32>
    %359 = vector.shape_cast %358 : vector<1x16x32xf32> to vector<16x32xf32>
    %360 = vector.shape_cast %307 : vector<16x32xf32> to vector<1x16x32xf32>
    tpu.vector_store %arg31[%c0_138, %c0_139, %c0_140], %360 {strides = array<i32>} : memref<1x16x32xf32, #tpu.memory_space<vmem>>, vector<1x16x32xf32>,
    %c0_141 = arith.constant 0 : index
    %c0_142 = arith.constant 0 : index
    %c0_143 = arith.constant 0 : index
    %361 = vector.load %arg32[%c0_141, %c0_142, %c0_143] : memref<1x8x64xf32, #tpu.memory_space<vmem>>, vector<1x8x64xf32>
    %362 = vector.shape_cast %361 : vector<1x8x64xf32> to vector<8x64xf32>
    %363 = vector.shape_cast %357 : vector<8x64xf32> to vector<1x8x64xf32>
    tpu.vector_store %arg32[%c0_141, %c0_142, %c0_143], %363 {strides = array<i32>} : memref<1x8x64xf32, #tpu.memory_space<vmem>>, vector<1x8x64xf32>,
    return
  }
  func.func @transform_0(%arg0: i32) -> (i32, i32, i32) {
    %c0_i32 = arith.constant 0 : i32
    %c0_i32_0 = arith.constant 0 : i32
    %c0_i32_1 = arith.constant 0 : i32
    return %arg0, %c0_i32, %c0_i32_0 : i32, i32, i32
  }
  func.func @transform_1(%arg0: i32) -> (i32, i32, i32) {
    %c0_i32 = arith.constant 0 : i32
    %c0_i32_0 = arith.constant 0 : i32
    %c0_i32_1 = arith.constant 0 : i32
    return %arg0, %c0_i32, %c0_i32_0 : i32, i32, i32
  }
  func.func @transform_2(%arg0: i32) -> (i32, i32) {
    %c0_i32 = arith.constant 0 : i32
    %c0_i32_0 = arith.constant 0 : i32
    %c0_i32_1 = arith.constant 0 : i32
    return %c0_i32, %c0_i32_0 : i32, i32
  }
  func.func @transform_3(%arg0: i32) -> (i32, i32) {
    %c0_i32 = arith.constant 0 : i32
    %c0_i32_0 = arith.constant 0 : i32
    %c0_i32_1 = arith.constant 0 : i32
    return %c0_i32, %c0_i32_0 : i32, i32
  }
  func.func @transform_4(%arg0: i32) -> (i32, i32) {
    %c0_i32 = arith.constant 0 : i32
    %c0_i32_0 = arith.constant 0 : i32
    %c0_i32_1 = arith.constant 0 : i32
    return %c0_i32, %c0_i32_0 : i32, i32
  }
  func.func @transform_5(%arg0: i32) -> (i32, i32) {
    %c0_i32 = arith.constant 0 : i32
    %c0_i32_0 = arith.constant 0 : i32
    %c0_i32_1 = arith.constant 0 : i32
    return %c0_i32, %c0_i32_0 : i32, i32
  }
  func.func @transform_6(%arg0: i32) -> (i32, i32) {
    %c0_i32 = arith.constant 0 : i32
    %c0_i32_0 = arith.constant 0 : i32
    %c0_i32_1 = arith.constant 0 : i32
    return %c0_i32, %c0_i32_0 : i32, i32
  }
  func.func @transform_7(%arg0: i32) -> (i32, i32) {
    %c0_i32 = arith.constant 0 : i32
    %c0_i32_0 = arith.constant 0 : i32
    %c0_i32_1 = arith.constant 0 : i32
    return %c0_i32, %c0_i32_0 : i32, i32
  }
  func.func @transform_8(%arg0: i32) -> (i32, i32) {
    %c0_i32 = arith.constant 0 : i32
    %c0_i32_0 = arith.constant 0 : i32
    %c0_i32_1 = arith.constant 0 : i32
    return %c0_i32, %c0_i32_0 : i32, i32
  }
  func.func @transform_9(%arg0: i32) -> (i32, i32) {
    %c0_i32 = arith.constant 0 : i32
    %c0_i32_0 = arith.constant 0 : i32
    %c0_i32_1 = arith.constant 0 : i32
    return %c0_i32, %c0_i32_0 : i32, i32
  }
  func.func @transform_10(%arg0: i32) -> (i32, i32) {
    %c0_i32 = arith.constant 0 : i32
    %c0_i32_0 = arith.constant 0 : i32
    %c0_i32_1 = arith.constant 0 : i32
    return %c0_i32, %c0_i32_0 : i32, i32
  }
  func.func @transform_11(%arg0: i32) -> (i32, i32) {
    %c0_i32 = arith.constant 0 : i32
    %c0_i32_0 = arith.constant 0 : i32
    %c0_i32_1 = arith.constant 0 : i32
    return %c0_i32, %c0_i32_0 : i32, i32
  }
  func.func @transform_12(%arg0: i32) -> (i32, i32) {
    %c0_i32 = arith.constant 0 : i32
    %c0_i32_0 = arith.constant 0 : i32
    %c0_i32_1 = arith.constant 0 : i32
    return %c0_i32, %c0_i32_0 : i32, i32
  }
  func.func @transform_13(%arg0: i32) -> (i32, i32) {
    %c0_i32 = arith.constant 0 : i32
    %c0_i32_0 = arith.constant 0 : i32
    %c0_i32_1 = arith.constant 0 : i32
    return %c0_i32, %c0_i32_0 : i32, i32
  }
  func.func @transform_14(%arg0: i32) -> (i32, i32) {
    %c0_i32 = arith.constant 0 : i32
    %c0_i32_0 = arith.constant 0 : i32
    %c0_i32_1 = arith.constant 0 : i32
    return %c0_i32, %c0_i32_0 : i32, i32
  }
  func.func @transform_15(%arg0: i32) -> (i32, i32) {
    %c0_i32 = arith.constant 0 : i32
    %c0_i32_0 = arith.constant 0 : i32
    %c0_i32_1 = arith.constant 0 : i32
    return %c0_i32, %c0_i32_0 : i32, i32
  }
  func.func @transform_16(%arg0: i32) -> (i32, i32) {
    %c0_i32 = arith.constant 0 : i32
    %c0_i32_0 = arith.constant 0 : i32
    %c0_i32_1 = arith.constant 0 : i32
    return %c0_i32, %c0_i32_0 : i32, i32
  }
  func.func @transform_17(%arg0: i32) -> (i32, i32) {
    %c0_i32 = arith.constant 0 : i32
    %c0_i32_0 = arith.constant 0 : i32
    %c0_i32_1 = arith.constant 0 : i32
    return %c0_i32, %c0_i32_0 : i32, i32
  }
  func.func @transform_18(%arg0: i32) -> (i32, i32) {
    %c0_i32 = arith.constant 0 : i32
    %c0_i32_0 = arith.constant 0 : i32
    %c0_i32_1 = arith.constant 0 : i32
    return %c0_i32, %c0_i32_0 : i32, i32
  }
  func.func @transform_19(%arg0: i32) -> (i32, i32) {
    %c0_i32 = arith.constant 0 : i32
    %c0_i32_0 = arith.constant 0 : i32
    %c0_i32_1 = arith.constant 0 : i32
    return %c0_i32, %c0_i32_0 : i32, i32
  }
  func.func @transform_20(%arg0: i32) -> (i32, i32) {
    %c0_i32 = arith.constant 0 : i32
    %c0_i32_0 = arith.constant 0 : i32
    %c0_i32_1 = arith.constant 0 : i32
    return %c0_i32, %c0_i32_0 : i32, i32
  }
  func.func @transform_21(%arg0: i32) -> (i32, i32) {
    %c0_i32 = arith.constant 0 : i32
    %c0_i32_0 = arith.constant 0 : i32
    %c0_i32_1 = arith.constant 0 : i32
    return %c0_i32, %c0_i32_0 : i32, i32
  }
  func.func @transform_22(%arg0: i32) -> (i32, i32) {
    %c0_i32 = arith.constant 0 : i32
    %c0_i32_0 = arith.constant 0 : i32
    %c0_i32_1 = arith.constant 0 : i32
    return %c0_i32, %c0_i32_0 : i32, i32
  }
  func.func @transform_23(%arg0: i32) -> (i32, i32) {
    %c0_i32 = arith.constant 0 : i32
    %c0_i32_0 = arith.constant 0 : i32
    %c0_i32_1 = arith.constant 0 : i32
    return %c0_i32, %c0_i32_0 : i32, i32
  }
  func.func @transform_24(%arg0: i32) -> (i32, i32) {
    %c0_i32 = arith.constant 0 : i32
    %c0_i32_0 = arith.constant 0 : i32
    %c0_i32_1 = arith.constant 0 : i32
    return %c0_i32, %c0_i32_0 : i32, i32
  }
  func.func @transform_25(%arg0: i32) -> (i32, i32) {
    %c0_i32 = arith.constant 0 : i32
    %c0_i32_0 = arith.constant 0 : i32
    %c0_i32_1 = arith.constant 0 : i32
    return %c0_i32, %c0_i32_0 : i32, i32
  }
  func.func @transform_26(%arg0: i32) -> (i32, i32) {
    %c0_i32 = arith.constant 0 : i32
    %c0_i32_0 = arith.constant 0 : i32
    %c0_i32_1 = arith.constant 0 : i32
    return %c0_i32, %c0_i32_0 : i32, i32
  }
  func.func @transform_27(%arg0: i32) -> (i32, i32) {
    %c0_i32 = arith.constant 0 : i32
    %c0_i32_0 = arith.constant 0 : i32
    %c0_i32_1 = arith.constant 0 : i32
    return %c0_i32, %c0_i32_0 : i32, i32
  }
  func.func @transform_28(%arg0: i32) -> (i32, i32) {
    %c0_i32 = arith.constant 0 : i32
    %c0_i32_0 = arith.constant 0 : i32
    %c0_i32_1 = arith.constant 0 : i32
    return %c0_i32, %c0_i32_0 : i32, i32
  }
  func.func @transform_29(%arg0: i32) -> (i32, i32) {
    %c0_i32 = arith.constant 0 : i32
    %c0_i32_0 = arith.constant 0 : i32
    %c0_i32_1 = arith.constant 0 : i32
    return %c0_i32, %c0_i32_0 : i32, i32
  }
  func.func @transform_30(%arg0: i32) -> (i32, i32, i32) {
    %c0_i32 = arith.constant 0 : i32
    %c0_i32_0 = arith.constant 0 : i32
    %c0_i32_1 = arith.constant 0 : i32
    return %arg0, %c0_i32, %c0_i32_0 : i32, i32, i32
  }
  func.func @transform_31(%arg0: i32) -> (i32, i32, i32) {
    %c0_i32 = arith.constant 0 : i32
    %c0_i32_0 = arith.constant 0 : i32
    %c0_i32_1 = arith.constant 0 : i32
    return %arg0, %c0_i32, %c0_i32_0 : i32, i32, i32
  }
}

</mosaic_0001>

<bundles_post_ra>
// kernel: tpu_custom_call.1
= control target key start
LH: loop header
LB: loop body
LE: loop exit
PB: predicated region body
PF: predicated region fallthrough
CT: control target
= control target key end

     0   :  { %s4460_s6 = smov 1   ;;  %s4461_s10 = smov 2   ;;  %s5201_s0 = inlined_call_operand.smem [shape: u32[32], index: -1, kind: input, shape index: {}] }
   0x1   :  { %s4523_s5 = sld [smem:[%s5201_s0]]   ;;  %s4462_s14 = smov 3  }
   0x2   :  { %s4528_s9 = sld [smem:[%s5201_s0 + %s4460_s6]]   ;;  %s4463_s18 = smov 4  }
   0x3   :  { %s4533_s13 = sld [smem:[%s5201_s0 + %s4461_s10]]   ;;  %s4464_s22 = smov 5  }
   0x4   :  { %s4538_s17 = sld [smem:[%s5201_s0 + %s4462_s14]]   ;;  %s4465_s26 = smov 6  }
   0x5   :  { %s4543_s21 = sld [smem:[%s5201_s0 + %s4463_s18]]   ;;  %s4466_s30 = smov 7  }
   0x6   :  { %s4548_s25 = sld [smem:[%s5201_s0 + %s4464_s22]]   ;;  %s4467_s4 = smov 8  }
   0x7   :  { %5216 = sst [smem:[#allocation18_spill]] %s4523_s5  ;;  %s4468_s10 = smov 9  }
   0x8   :  { %s4553_s29 = sld [smem:[%s5201_s0 + %s4465_s26]]   ;;  %s4469_s15 = smov 10  }
   0x9   :  { %s4558_s3 = sld [smem:[%s5201_s0 + %s4466_s30]]   ;;  %s4470_s20 = smov 11  }
   0xa   :  { %s4563_s8 = sld [smem:[%s5201_s0 + %s4467_s4]]   ;;  %s4471_s26 = smov 12  }
   0xb   :  { %s4568_s14 = sld [smem:[%s5201_s0 + %s4468_s10]]   ;;  %s4472_s1 = smov 13  }
   0xc   :  { %s4573_s19 = sld [smem:[%s5201_s0 + %s4469_s15]]   ;;  %s4473_s7 = smov 14  }
   0xd   :  { %s4578_s24 = sld [smem:[%s5201_s0 + %s4470_s20]]   ;;  %s4474_s15 = smov 15  }
   0xe   :  { %s4583_s30 = sld [smem:[%s5201_s0 + %s4471_s26]]   ;;  %s4475_s22 = smov 16  }
   0xf   :  { %5217 = sst [smem:[#allocation19_spill]] %s4558_s3  ;;  %s4476_s28 = smov 17  }
  0x10   :  { %5218 = sst [smem:[#allocation20_spill]] %s4563_s8 }
  0x11   :  { %5219 = sst [smem:[#allocation21_spill]] %s4568_s14 }
  0x12   :  { %s4588_s6 = sld [smem:[%s5201_s0 + %s4472_s1]]  }
  0x13   :  { %s4593_s12 = sld [smem:[%s5201_s0 + %s4473_s7]]   ;;  %s4477_s7 = smov 18  }
  0x14   :  { %s4598_s20 = sld [smem:[%s5201_s0 + %s4474_s15]]   ;;  %s4478_s15 = smov 19  }
  0x15   :  { %s4603_s27 = sld [smem:[%s5201_s0 + %s4475_s22]]   ;;  %s4479_s22 = smov 20  }
  0x16   :  { %s4608_s4 = sld [smem:[%s5201_s0 + %s4476_s28]]   ;;  %s4480_s28 = smov 21  }
  0x17   :  { %s4613_s14 = sld [smem:[%s5201_s0 + %s4477_s7]]   ;;  %s4481_s7 = smov 22  }
  0x18   :  { %5220 = sst [smem:[#allocation22_spill]] %s4588_s6 }
  0x19   :  { %5221 = sst [smem:[#allocation23_spill]] %s4593_s12 }
  0x1a   :  { %5222 = sst [smem:[#allocation24_spill]] %s4598_s20 }
  0x1b   :  { %5223 = sst [smem:[#allocation25_spill]] %s4603_s27 }
  0x1c   :  { %5224 = sst [smem:[#allocation26_spill]] %s4608_s4 }
  0x1d   :  { %s4618_s8 = sld [smem:[%s5201_s0 + %s4478_s15]]   ;;  %s4482_s15 = smov 23  }
  0x1e   :  { %s4623_s27 = sld [smem:[%s5201_s0 + %s4479_s22]]   ;;  %s4483_s22 = smov 24  }
  0x1f   :  { %s4628_s4 = sld [smem:[%s5201_s0 + %s4480_s28]]   ;;  %s4484_s28 = smov 25  }
  0x20   :  { %s4633_s20 = sld [smem:[%s5201_s0 + %s4481_s7]]   ;;  %s4485_s7 = smov 26  }
  0x23   :  { %5225 = sst [smem:[#allocation27_spill]] %s4618_s8 }
  0x24   :  { %5226 = sst [smem:[#allocation28_spill]] %s4623_s27 }
  0x25   :  { %5227 = sst [smem:[#allocation29_spill]] %s4628_s4 }
  0x26   :  { %5228 = sst [smem:[#allocation30_spill]] %s4633_s20 }
  0x27   :  { %s4638_s8 = sld [smem:[%s5201_s0 + %s4482_s15]]   ;;  %s4486_s15 = smov 27  }
  0x28   :  { %s4643_s27 = sld [smem:[%s5201_s0 + %s4483_s22]]   ;;  %s4487_s22 = smov 28  }
  0x29   :  { %s4648_s4 = sld [smem:[%s5201_s0 + %s4484_s28]]   ;;  %s4488_s28 = smov 29  }
  0x2a   :  { %s4653_s20 = sld [smem:[%s5201_s0 + %s4485_s7]]   ;;  %s4489_s7 = smov 30  }
  0x2b   :  { %s4658_s3 = sld [smem:[%s5201_s0 + %s4486_s15]]   ;;  %s4490_s15 = smov 31  }
  0x2c   :  { %s4678_s12 = sld [smem:[%s5201_s0 + %s4490_s15]]  }
  0x2d   :  { %5229 = sst [smem:[#allocation31_spill]] %s4638_s8 }
  0x2e   :  { %5230 = sst [smem:[#allocation32_spill]] %s4643_s27 }
  0x2f   :  { %5231 = sst [smem:[#allocation33_spill]] %s4648_s4 }
  0x30   :  { %5232 = sst [smem:[#allocation34_spill]] %s4653_s20 }
  0x31   :  { %5233 = sst [smem:[#allocation35_spill]] %s4658_s3 }
  0x32   :  { %s4663_s27 = sld [smem:[%s5201_s0 + %s4487_s22]]  }
  0x33   :  { %s4668_s4 = sld [smem:[%s5201_s0 + %s4488_s28]]  }
  0x34   :  { %s4673_s20 = sld [smem:[%s5201_s0 + %s4489_s7]]  }
  0x35   :  { %69 = vsyncpa [#allocation3], 0 }
  0x36   :  { %70 = vsyncpa [#allocation6], 0 }
  0x37   :  { %71 = vsyncpa [#allocation9], 0 }
  0x38   :  { %72 = vsyncpa [#allocation4], 0 }
  0x39   :  { %74 = vsyncpa [#allocation4 + $0x1], 0 }
  0x3a   :  { %75 = vsyncpa [#allocation12], 0 }
  0x3b   :  { %77 = vsyncpa [#allocation12 + $0x1], 0  ;;  %s4680_s22 = smov 0   ;;  %s4682_s23 = smov 0  }
  0x3c   :  { %s4684_s26 = smov 0   ;;  %s4686_s28 = smov 0  }
  0x3d LB: > { %5234 = sst [smem:[#allocation36_spill]] %s4446_s22  ;;  %s4701_s0 = sadd.s32 4294967295, %s4458_s28   ;;  %s4458_s28 = sphi %s4686_s28, %s5273_s28   ;;  %s4454_s26 = sphi %s4684_s26, %s5275_s26   ;;  %s4450_s23 = sphi %s4682_s23, %s5277_s23   ;;  %s4446_s22 = sphi %s4680_s22, %s5276_s22  }
  0x3e   : > { %5235 = sst [smem:[#allocation37_spill]] %s4454_s26  ;;  %s3560_s1 = sadd.s32 4294967294, %s4458_s28  }
  0x3f   : > { %s4705_s2 = sadd.s32 1, %s4458_s28   ;;  %s730_s7 = sadd.s32 1, %s4454_s26 }
  0x40   : > { %5236 = sst [smem:[#allocation38_spill]] %s4705_s2  ;;  %s727_s10 = ssub.s32 %s4458_s28, %s4705_s2 }
  0x41   : > { %p740_p0 = scmp.ne.s32.totalorder %s4454_s26, %s4450_s23  ;;  %p728_p1 = scmp.eq.s32.totalorder %s727_s10, 0 }
  0x42   : > { %p741_p2 = scmp.eq.s32.totalorder %s4701_s0, 1  ;;  %p746_p3 = scmp.ne.s32.totalorder %s4450_s23, %s4446_s22 }
  0x43   : > { %p747_p4 = scmp.eq.s32.totalorder %s3560_s1, 1  ;;  %p3561_p7 = scmp.ge.s32.totalorder %s4458_s28, 1 }
  0x44   : > { %s4716_s11 = scalar_select %p728_p1, %s4454_s26, %s730_s7  }
  0x45   : > { %p4718_p5 = por %p741_p2, %p740_p0  ;;  %p4722_p6 = por %p747_p4, %p746_p3 }
  0x46   : > { %5237 = sst [smem:[#allocation39_spill]] %s4716_s11  ;;  %p780_p8 = scmp.lt.s32.totalorder %s4458_s28, 3 }
  0x47   : > { %s5238_s15 = scalar_select %p4718_p5, 1, 0 }
  0x48   : > { %s5239_s16 = scalar_select %p4722_p6, 1, 0 }
  0x49   : > { %p5211_p9 = scmp.eq.s32.totalorder %s4701_s0, 0  ;;  %p4729_p10 = pnand %p3561_p7, %p780_p8 }
  0x4a   : > { %5240 = sst [smem:[#allocation40_spill]] %s5239_s16  ;;  %s4491_s1 = smov [#allocation5]  }
  0x4b   : > { %s5241_s18 = scalar_select %p4729_p10, 1, 0 }
  0x4c   : > { %p4013_p11 = pneg %p4729_p10  ;;  %s850_s7 = sshll.u32 %s4491_s1, 4  ;;  %s851_s7 = int_to_ptr.vmem [resolvable:$true] %s850_s7 }
  0x4d   : > { %s4492_s11 = smov [#allocation2]   ;;  %s4493_s2 = smov [#allocation7]  }
  0x4e   : > { %p4737_p12 = pnand %p5211_p9, %p4013_p11  ;;  %s822_s26 = sshll.u32 %s4492_s11, 4  ;;  %s823_s26 = int_to_ptr.vmem [resolvable:$true] %s822_s26 }
  0x4f   : > { %s876_s16 = sshll.u32 %s4493_s2, 4  ;;  %s4263_s22 = scalar_lea.vmem %s851_s7, 256  ;;  %s877_s16 = int_to_ptr.vmem [resolvable:$true] %s876_s16 }
  0x50   : > { %p4254_p13 = pneg %p4737_p12  ;;  %p4264_p0 = scmp.ne.s32.totalorder %s851_s7, %s4263_s22 }
  0x51   : > { %p4271_p3 = scmp.lt.s32.totalorder %s851_s7, %s851_s7  ;;  %p4272_p4 = scmp.lt.s32.totalorder %s4263_s22, %s4263_s22 }
  0x52   : > { %p4266_p1 = pnand %p4264_p0, %p4254_p13 }
  0x53   : > { %p4273_p7 = por %p4272_p4, %p4271_p3 }
  0x54   : > { %p4267_p2 = pneg %p4266_p1 }
  0x56   : > { %p4274_p8 = pnand %p4273_p7, %p4267_p2 }
  0x58   : > { %4277 = shalt.err (!%p4274_p8)
}
  0x59   : > { %s4494_s1 = smov 64   ;;  %s4495_s11 = smov 4  }
  0x5a   : > { %4019 = dma.hbm_to_vmem [thread:$0]  (!%p4737_p12), %s4613_s14, 256, %s851_s7, [#allocation6], %s4494_s1, %s4494_s1, %s4495_s11  }
  0x5b   : > { %s4289_s2 = scalar_lea.vmem %s823_s26, 256  ;;  %p4297_p0 = scmp.lt.s32.totalorder %s823_s26, %s823_s26 }
  0x5c   : > { %p4290_p11 = scmp.ne.s32.totalorder %s823_s26, %s4289_s2  ;;  %p4298_p1 = scmp.lt.s32.totalorder %s4289_s2, %s4289_s2 }
  0x5e   : > { %p4292_p9 = pnand %p4290_p11, %p4254_p13  ;;  %p4299_p5 = por %p4298_p1, %p4297_p0 }
  0x60   : > { %p4293_p6 = pneg %p4292_p9 }
  0x62   : > { %p4300_p10 = pnand %p4299_p5, %p4293_p6 }
  0x64   : > { %4303 = shalt.err (!%p4300_p10)
}
  0x65   : > { %4016 = dma.hbm_to_vmem [thread:$0]  (!%p4737_p12), %s4583_s30, 256, %s823_s26, [#allocation3], %s4494_s1, %s4494_s1, %s4495_s11  }
  0x66   : > { %s4315_s22 = scalar_lea.vmem %s877_s16, 16  ;;  %s4322_s7 = scalar_lea.vmem %s877_s16, 32 }
  0x67   : > { %p4316_p2 = scmp.ne.s32.totalorder %s877_s16, %s4315_s22  ;;  %p4323_p7 = scmp.lt.s32.totalorder %s877_s16, %s877_s16 }
  0x68   : > { %p4324_p9 = scmp.lt.s32.totalorder %s4322_s7, %s4315_s22 }
  0x69   : > { %p4318_p3 = pnand %p4316_p2, %p4254_p13 }
  0x6a   : > { %p4325_p8 = por %p4324_p9, %p4323_p7 }
  0x6b   : > { %p4319_p4 = pneg %p4318_p3 }
  0x6d   : > { %p4326_p11 = pnand %p4325_p8, %p4319_p4 }
  0x6f   : > { %4329 = shalt.err (!%p4326_p11)
}
  0x70   : > { %s5243_s8 = sld [smem:[#allocation31_spill]]  ;;  %s4496_s2 = smov [#allocation8]  }
  0x71   : > { %s896_s26 = sshll.u32 %s4496_s2, 4  ;;  %s897_s26 = int_to_ptr.vmem [resolvable:$true] %s896_s26 }
  0x72   : > { %s4341_s1 = scalar_lea.vmem %s897_s26, 16  ;;  %s4348_s11 = scalar_lea.vmem %s897_s26, 32 }
  0x73   : > { %p4342_p5 = scmp.ne.s32.totalorder %s897_s26, %s4341_s1  ;;  %p4349_p0 = scmp.lt.s32.totalorder %s897_s26, %s897_s26 }
  0x74   : > { %p4350_p1 = scmp.lt.s32.totalorder %s4348_s11, %s4341_s1 }
  0x75   : > { %p4344_p6 = pnand %p4342_p5, %p4254_p13 }
  0x76   : > { %4022 = dma.hbm_to_vmem [thread:$0]  (!%p4737_p12), %s5243_s8, 16, %s877_s16, [#allocation6]  }
  0x77   : > { %p4345_p10 = pneg %p4344_p6  ;;  %p4351_p2 = por %p4350_p1, %p4349_p0 }
  0x79   : > { %p4352_p3 = pnand %p4351_p2, %p4345_p10 }
  0x7b   : > { %4355 = shalt.err (!%p4352_p3)
}
  0x7c   : > { %s5244_s3 = sld [smem:[#allocation35_spill]]  ;;  %p5245_p4 = scmp.ne.s32.totalorder %s5241_s18, 0 }
  0x7d   : > { %p5246_p7 = scmp.eq.s32.totalorder (!%p5245_p4), %s4701_s0, 0 }
  0x7e   : > { %930 = sbr.rel (%p5245_p4) target bundleno = 5949 (0x173d), region = 140 }
  0x82   : > { %4025 = dma.hbm_to_vmem [thread:$0]  (!%p4737_p12), %s5244_s3, 16, %s897_s26, [#allocation9]  }
  0x83   : > { %4425 = dma.done.wait (%p5246_p7), [#allocation3], 256   ;;  %p5247_p9 = pmov %p5246_p7 }
  0x84   : > { %p5248_p13 = pmov %p5246_p7 }
  0x85   : > { %4427 = vsyncadd (%p5247_p9), [#allocation3], 4294967040 }
  0x86   : > { %4429 = dma.done.wait (%p5248_p13), [#allocation6], 272   ;;  %p5249_p8 = pmov %p5246_p7 }
  0x87   : > { %p5250_p11 = pmov %p5246_p7 }
  0x88   : > { %4431 = vsyncadd (%p5249_p8), [#allocation6], 4294967024 }
  0x89   : > { %4433 = dma.done.wait (%p5250_p11), [#allocation9], 16   ;;  %p5251_p12 = pmov %p5246_p7 }
  0x8a   : > { %s5252_s5 = sld [smem:[#allocation18_spill]]  ;;  %p1031_p5 = scmp.lt.s32.totalorder %s4701_s0, 1  ;;  %v4497_v0 = vmov 0.0   ;;  %vm4498_vm0 = vmmov 0   ;;  %v4127_v1 = vld [vmem:[%s4533_s13 + $0x8] sm:$0xff]   ;;  %v4128_v2 = vld [vmem:[%s4533_s13] sm:$0xff]  }
  0x8b   : > { %4435 = vsyncadd (%p5251_p12), [#allocation9], 4294967280  ;;  %3781 = vmatprep.subr.bf16.mxu1 %v4497_v0  ;;  %3785 = vmatprep.mubr.msk.bf16.mxu1 %vm4498_vm0, %v4497_v0  ;;  %vm1085_vm1 = vcmask 261120   ;;  %v4129_v6 = vld [vmem:[%s4543_s21 + $0x18] sm:$0xff]   ;;  %v4130_v7 = vld [vmem:[%s4543_s21 + $0x10] sm:$0xff]   ;;  %vm1160_vm2 = vcmask 523264  }
  0x8c   : > { %s1032_s16 = scalar_select %p1031_p5, %s4701_s0, 1  ;;  %3801 = vmatprep.subr.bf16.mxu0 %v4497_v0  ;;  %3803 = vmatprep.mubr.msk.bf16.mxu0 %vm4498_vm0, %v4497_v0  ;;  %v4131_v8 = vld [vmem:[%s4543_s21 + $0x8] sm:$0xff]   ;;  %v4132_v9 = vld [vmem:[%s4543_s21] sm:$0xff]   ;;  %vm1206_vm3 = vcmask 64512   ;;  %vm1283_vm4 = vcmask 1043456   ;;  %vm2103_vm5 = vcmask 130048  }
  0x8d   : > { %3782 = vmatpush3.bf16.msra.mxu1 %v4127_v1  ;;  %v3581_v16 = vld [vmem:[%s4548_s25] ss:$0 sm:$0xff]  ;;  %s4499_s2 = smov 120   ;;  %s4500_s26 = smov 88  }
  0x8e   : > { %s3681_s18 = sshll.u32 %s1032_s16, 4  ;;  %3783 = vmatprep.subr.bf16.mxu1 %v4497_v0  ;;  %s3576_s22 = sshll.u32 %s1032_s16, 3  ;;  %v3577_v19 = vld [vmem:[%s4538_s17] ss:$0 sm:$0xff] }
  0x8f   : > { %s4809_s7 = scalar_lea.vmem %s4528_s9, %s3576_s22  ;;  %s4501_s1 = smov 96  }
  0x90   : > { %s4790_s10 = scalar_lea.vmem %s5252_s5, %s3681_s18  ;;  %v1043_v10 = vld [vmem:[%s4809_s7] sm:$0xff]  ;;  %s4502_s11 = smov 112  }
  0x91   : > { %v1041_v3 = vld [vmem:[%s4790_s10] sm:$0xff]  ;;  %v1042_v4 = vld [vmem:[%s4790_s10 + $0x8] sm:$0xff]  ;;  %3784 = vmatpush3.bf16.msra.mxu1 %v4128_v2  ;;  %v4815_v11 = vpack.c.bf16 %v1043_v10, %v1043_v10  ;;  %s4503_s16 = smov 80   ;;  %s4504_s18 = smov 104  }
  0x92   : > { %v4797_v5 = vpack.c.bf16 %v1042_v4, %v1041_v3  ;;  %3789 = vmatprep.subr.bf16.mxu1 %v4497_v0  ;;  %s4505_s22 = smov 72   ;;  %s5253_s6 = sld [smem:[#allocation22_spill]] }
  0x93   : > { %p5269_p10 = scmp.ne.s32.totalorder %s5238_s15, 0 }
  0x94   : > { %3786 = vmatmul.mubr.msk.bf16.vlgmr.msra.gmra.mxu1 %vm1085_vm1, %v4797_v5 }
  0x95   : > { %3790 = vmatpush3.bf16.msra.mxu1 %v4129_v6  ;;  %3797 = vmatprep.mubr.msk.bf16.mxu1 %vm4498_vm0, %v4497_v0 }
  0x96   : > { %3791 = vmatprep.subr.bf16.mxu1 %v4497_v0 }
  0x99   : > { %3792 = vmatpush3.bf16.msra.mxu1 %v4130_v7 }
  0x9a   : > { %3793 = vmatprep.subr.bf16.mxu1 %v4497_v0 }
  0x9d   : > { %3794 = vmatpush3.bf16.msra.mxu1 %v4131_v8 }
  0x9e   : > { %3795 = vmatprep.subr.bf16.mxu1 %v4497_v0 }
  0xa1   : > { %3796 = vmatpush3.bf16.msra.mxu1 %v4132_v9 }
  0xa2   : > { %3813 = vmatprep.subr.bf16.mxu1 %v4497_v0 }
  0xa4   : > { %3798 = vmatmul.mubr.msk.bf16.vlgmr.msra.gmra.mxu1 %vm1160_vm2, %v4815_v11 }
  0xa5   : > { %3815 = vmatprep.mubr.msk.bf16.mxu1 %vm4498_vm0, %v4497_v0 }
 0x154   : > { %v1123_v12 = vpop.f32.mrf.mxu1 }
 0x155   : > { %v1124_v24 = vadd.f32 %v3577_v19, %v1123_v12 }
 0x156   : > { %v3787_v13 = vpop.f32.mrf.mxu1 }
 0x158   : > { %v1126_v14 = vpop.f32.mrf.mxu1 }
 0x159   : > { %v1127_v21 = vadd.f32 %v3577_v19, %v1126_v14 }
 0x15a   : > { %v3788_v15 = vpop.f32.mrf.mxu1 }
 0x15b   : > { %v4829_v27 = vpack.c.bf16 %v1127_v21, %v1124_v24 }
 0x164   : > { %v1198_v17 = vpop.f32.mrf.mxu1 }
 0x165   : > { %v1199_v18 = vadd.f32 %v3581_v16, %v1198_v17 }
 0x166   : > { %v3799_v20 = vpop.f32.mrf.mxu1 }
 0x167   : > { %v4824_v22 = vpack.c.bf16 %v1199_v18, %v1199_v18  ;;  %v1058_v20 = vld [vmem:[%s4553_s29] sm:$0xf] }
 0x168   : > { %v1201_v23 = vpop.f32.mrf.mxu1  ;;  %v1505_v21 = vsel %vm1283_vm4, %v1058_v20, 0 }
 0x169   : > { %1332 = vrot.lane.b32.xlu0 %v4824_v22, %s4499_s2  ;;  %v1211_v25 = vsel %vm1206_vm3, %v4824_v22, 0  ;;  %v1059_v23 = vld [vmem:[%s4553_s29 + $0x4] sm:$0xf] }
 0x16a   : > { %v3800_v26 = vpop.f32.mrf.mxu1  ;;  %3802 = vmatpush3.bf16.xpose.msra.mxu0 %v1211_v25  ;;  %v1458_v24 = vsel %vm1283_vm4, %v1059_v23, 0 }
 0x16b   : > { %3807 = vmatprep.subr.bf16.mxu0 %v4497_v0 }
 0x16d   : > { %1330 = vrot.lane.b32.xlu0 %v4829_v27, %s4499_s2  ;;  %s4506_s2 = smov 64  }
 0x171   : > { %3804 = vmatmul.mubr.msk.bf16.vlgmr.msra.gmra.mxu0 %vm1206_vm3, %v4829_v27 }
 0x172   : > { %3809 = vmatprep.mubr.msk.bf16.mxu0 %vm4498_vm0, %v4497_v0 }
 0x1db   : > { %v1333_v28 = vpop.permute.xlu0 %1332 }
 0x1dc   : > { %v1338_v29 = vsel %vm1206_vm3, %v1333_v28, 0 }
 0x1dd   : > { %3814 = vmatpush3.bf16.xpose.msra.mxu1 %v1338_v29 }
 0x1de   : > { %3825 = vmatprep.subr.bf16.mxu1 %v4497_v0 }
 0x1df   : > { %v1331_v30 = vpop.permute.xlu0 %1330 }
 0x1e4   : > { %3816 = vmatmul.mubr.msk.bf16.vlgmr.msra.gmra.mxu1 %vm1206_vm3, %v1331_v30 }
 0x1e5   : > { %3827 = vmatprep.mubr.msk.bf16.mxu1 %vm4498_vm0, %v4497_v0  ;;  %3826 = vmatpush3.bf16.msra.mxu1 %v1458_v24 }
 0x1e6   : > { %3837 = vmatprep.subr.bf16.mxu1 %v4497_v0 }
 0x231   : > { %v1247_v31 = vpop.f32.mrf.mxu0 }
 0x232   : > { %v1254_v32 = vsel %vm1206_vm3, %v1247_v31, -inf }
 0x233   : > { %1255 = vmax.xlane.f32.xlu1 %v1254_v32  ;;  %v3805_v33 = vpop.f32.mrf.mxu0 }
 0x235   : > { %v1250_v34 = vpop.f32.mrf.mxu0 }
 0x236   : > { %v1257_v35 = vsel %vm1206_vm3, %v1250_v34, -inf }
 0x237   : > { %1258 = vmax.xlane.f32.xlu1 %v1257_v35  ;;  %v3806_v36 = vpop.f32.mrf.mxu0 }
 0x2a4   : > { %v1374_v37 = vpop.f32.mrf.mxu1 }
 0x2a5   : > { %v1381_v38 = vsel %vm1206_vm3, %v1374_v37, -inf }
 0x2a6   : > { %1382 = vmax.xlane.f32.xlu0 %v1381_v38  ;;  %v3817_v39 = vpop.f32.mrf.mxu1 }
 0x2a8   : > { %v1377_v40 = vpop.f32.mrf.mxu1 }
 0x2a9   : > { %v1384_v41 = vsel %vm1206_vm3, %v1377_v40, -inf }
 0x2aa   : > { %1385 = vmax.xlane.f32.xlu1 %v1384_v41  ;;  %v3818_v42 = vpop.f32.mrf.mxu1 }
 0x2bc   : > { %v1256_v43 = vpop.xlane.xlu1 %1255  ;;  %1404 = vrot.lane.b32.xlu0 %v4824_v22, %s4500_s26  ;;  %s5254_s26 = sld [smem:[#allocation23_spill]] }
 0x2bd   : > { %v1260_v44 = vsub.f32 %v1247_v31, %v1256_v43 }
 0x2bf   : > { %v1262_v45 = vmul.f32 1.442695, %v1260_v44 }
 0x2c0   : > { %v1259_v46 = vpop.xlane.xlu1 %1258 }
 0x2c1   : > { %4181 = vpow2.f32 %v1262_v45  ;;  %v1261_v47 = vsub.f32 %v1250_v34, %v1259_v46 }
 0x2c3   : > { %v1264_v48 = vmul.f32 1.442695, %v1261_v47 }
 0x2c5   : > { %4183 = vpow2.f32 %v1264_v48 }
 0x2ce   : > { %v4182_v49 = vpop.eup %4181 }
 0x2cf   : > { %v1266_v50 = vsel %vm1206_vm3, %v4182_v49, 0.0 }
 0x2d0   : > { %1267 = vadd.xlane.f32.xlu1 %v1266_v50 }
 0x2d2   : > { %v4184_v51 = vpop.eup %4183 }
 0x2d3   : > { %v1269_v52 = vsel %vm1206_vm3, %v4184_v51, 0.0 }
 0x2d4   : > { %1270 = vadd.xlane.f32.xlu1 %v1269_v52 }
 0x32f   : > { %v1383_v53 = vpop.xlane.xlu0 %1382 }
 0x330   : > { %v1387_v54 = vsub.f32 %v1374_v37, %v1383_v53 }
 0x332   : > { %v1389_v55 = vmul.f32 1.442695, %v1387_v54 }
 0x333   : > { %v1386_v56 = vpop.xlane.xlu1 %1385  ;;  %v1405_v12 = vpop.permute.xlu0 %1404 }
 0x334   : > { %4185 = vpow2.f32 %v1389_v55  ;;  %v1388_v57 = vsub.f32 %v1377_v40, %v1386_v56  ;;  %v1410_v14 = vsel %vm1283_vm4, %v1405_v12, 0 }
 0x336   : > { %v1391_v58 = vmul.f32 1.442695, %v1388_v57 }
 0x338   : > { %4187 = vpow2.f32 %v1391_v58 }
 0x341   : > { %v4186_v59 = vpop.eup %4185 }
 0x342   : > { %v1393_v60 = vsel %vm1206_vm3, %v4186_v59, 0.0 }
 0x343   : > { %1394 = vadd.xlane.f32.xlu1 %v1393_v60 }
 0x345   : > { %v4188_v61 = vpop.eup %4187 }
 0x346   : > { %v1396_v62 = vsel %vm1206_vm3, %v4188_v61, 0.0 }
 0x347   : > { %1397 = vadd.xlane.f32.xlu1 %v1396_v62 }
 0x358   : > { %1278 = vrot.lane.b32.xlu1 %v4824_v22, %s4501_s1 }
 0x359   : > { %v1268_v63 = vpop.xlane.xlu1 %1267 }
 0x35c   : > { %1550 = vrot.lane.b32.xlu1 %v4824_v22, %s4502_s11 }
 0x35d   : > { %v1271_v1 = vpop.xlane.xlu1 %1270 }
 0x35e   : > { %4189 = vrcp.f32 %v1271_v1 }
 0x35f   : > { %4191 = vrcp.f32 %v1268_v63 }
 0x360   : > { %1548 = vrot.lane.b32.xlu1 %v4829_v27, %s4502_s11 }
 0x36b   : > { %v4190_v3 = vpop.eup %4189 }
 0x36c   : > { %v4192_v6 = vpop.eup %4191  ;;  %v1275_v7 = vmul.f32 %v4190_v3, %v4184_v51 }
 0x36d   : > { %v1274_v10 = vmul.f32 %v4192_v6, %v4182_v49 }
 0x36f   : > { %v1276_v13 = vpack.c.bf16 %v1275_v7, %v1274_v10 }
 0x3cc   : > { %v1395_v2 = vpop.xlane.xlu1 %1394 }
 0x3cd   : > { %4193 = vrcp.f32 %v1395_v2 }
 0x3d0   : > { %v1398_v4 = vpop.xlane.xlu1 %1397 }
 0x3d1   : > { %4195 = vrcp.f32 %v1398_v4 }
 0x3d4   : > { %v1279_v8 = vpop.permute.xlu1 %1278 }
 0x3d5   : > { %v1285_v9 = vsel %vm1283_vm4, %v1279_v8, 0 }
 0x3d6   : > { %3808 = vmatpush3.bf16.msra.mxu0 %v1285_v9 }
 0x3d7   : > { %3819 = vmatprep.subr.bf16.mxu0 %v4497_v0 }
 0x3d8   : > { %v1551_v33 = vpop.permute.xlu1 %1550 }
 0x3d9   : > { %3810 = vmatmul.mubr.msk.bf16.vlgmr.msra.gmra.mxu0 %vm1206_vm3, %v1276_v13  ;;  %v1556_v37 = vsel %vm1206_vm3, %v1551_v33, 0 }
 0x3da   : > { %3820 = vmatpush3.bf16.msra.mxu0 %v1410_v14  ;;  %3821 = vmatprep.mubr.msk.bf16.mxu0 %vm4498_vm0, %v4497_v0  ;;  %v4194_v15 = vpop.eup %4193 }
 0x3db   : > { %3831 = vmatprep.subr.bf16.mxu0 %v4497_v0  ;;  %v1401_v17 = vmul.f32 %v4194_v15, %v4186_v59  ;;  %v1060_v15 = vld [vmem:[%s4553_s29 + $0x8] sm:$0xf] }
 0x3dc   : > { %v1549_v38 = vpop.permute.xlu1 %1548 }
 0x3de   : > { %v4196_v16 = vpop.eup %4195 }
 0x3df   : > { %v1402_v18 = vmul.f32 %v4196_v16, %v4188_v61  ;;  %v1676_v16 = vsel %vm1283_vm4, %v1060_v15, 0  ;;  %v3608_v15 = vld [vmem:[%s5253_s6] ss:$0 sm:$0xff] }
 0x3e1   : > { %v1403_v19 = vpack.c.bf16 %v1402_v18, %v1401_v17 }
 0x3e3   : > { %3822 = vmatmul.mubr.msk.bf16.vlgmr.msra.gmra.mxu0 %vm1206_vm3, %v1403_v19 }
 0x3e4   : > { %3833 = vmatprep.mubr.msk.bf16.mxu0 %vm4498_vm0, %v4497_v0  ;;  %3832 = vmatpush3.bf16.msra.mxu0 %v1505_v21 }
 0x3e5   : > { %3843 = vmatprep.subr.bf16.mxu0 %v4497_v0 }
 0x499   : > { %v1321_v25 = vpop.f32.mrf.mxu0 }
 0x49b   : > { %v3811_v26 = vpop.f32.mrf.mxu0 }
 0x49d   : > { %v1324_v28 = vpop.f32.mrf.mxu0 }
 0x49e   : > { %v1328_v29 = vpack.c.bf16 %v1324_v28, %v1321_v25 }
 0x49f   : > { %v3812_v30 = vpop.f32.mrf.mxu0 }
 0x4a0   : > { %3834 = vmatmul.mubr.msk.bf16.vlgmr.msra.gmra.mxu0 %vm1206_vm3, %v1328_v29 }
 0x4a1   : > { %3845 = vmatprep.mubr.msk.bf16.mxu0 %vm4498_vm0, %v4497_v0 }
 0x4a3   : > { %v1446_v31 = vpop.f32.mrf.mxu0 }
 0x4a5   : > { %v3823_v32 = vpop.f32.mrf.mxu0 }
 0x4a7   : > { %v1449_v34 = vpop.f32.mrf.mxu0 }
 0x4a8   : > { %v1453_v35 = vpack.c.bf16 %v1449_v34, %v1446_v31 }
 0x4a9   : > { %v3824_v36 = vpop.f32.mrf.mxu0 }
 0x4aa   : > { %3828 = vmatmul.mubr.msk.bf16.vlgmr.msra.gmra.mxu1 %vm1206_vm3, %v1453_v35 }
 0x4ab   : > { %3838 = vmatpush3.bf16.xpose.msra.mxu1 %v1556_v37  ;;  %3839 = vmatprep.mubr.msk.bf16.mxu1 %vm4498_vm0, %v4497_v0 }
 0x4ac   : > { %3849 = vmatprep.subr.bf16.mxu1 %v4497_v0 }
 0x4b2   : > { %3840 = vmatmul.mubr.msk.bf16.vlgmr.msra.gmra.mxu1 %vm1206_vm3, %v1549_v38 }
 0x4b3   : > { %3851 = vmatprep.mubr.msk.bf16.mxu1 %vm4498_vm0, %v4497_v0  ;;  %3850 = vmatpush3.bf16.msra.mxu1 %v1676_v16 }
 0x4b4   : > { %3861 = vmatprep.subr.bf16.mxu1 %v4497_v0 }
 0x560   : > { %v1541_v39 = vpop.f32.mrf.mxu0 }
 0x562   : > { %v3835_v40 = vpop.f32.mrf.mxu0 }
 0x564   : > { %v1544_v41 = vpop.f32.mrf.mxu0 }
 0x566   : > { %v3836_v42 = vpop.f32.mrf.mxu0 }
 0x56a   : > { %v1494_v43 = vpop.f32.mrf.mxu1 }
 0x56b   : > { %v4884_v44 = vadd.f32 %v1541_v39, %v1494_v43 }
 0x56c   : > { %v3829_v45 = vpop.f32.mrf.mxu1 }
 0x56e   : > { %v1497_v46 = vpop.f32.mrf.mxu1 }
 0x56f   : > { %v4886_v47 = vadd.f32 %v1544_v41, %v1497_v46 }
 0x570   : > { %v3830_v48 = vpop.f32.mrf.mxu1 }
 0x572   : > { %v1592_v49 = vpop.f32.mrf.mxu1 }
 0x573   : > { %v1599_v50 = vsel %vm1206_vm3, %v1592_v49, -inf }
 0x574   : > { %1600 = vmax.xlane.f32.xlu1 %v1599_v50  ;;  %v3841_v51 = vpop.f32.mrf.mxu1 }
 0x576   : > { %v1595_v52 = vpop.f32.mrf.mxu1 }
 0x577   : > { %v1602_v53 = vsel %vm1206_vm3, %v1595_v52, -inf }
 0x578   : > { %1603 = vmax.xlane.f32.xlu0 %v1602_v53  ;;  %v3842_v54 = vpop.f32.mrf.mxu1 }
 0x579   : > { %v1061_v54 = vld [vmem:[%s4553_s29 + $0xc] sm:$0xf] }
 0x5fd   : > { %v1601_v55 = vpop.xlane.xlu1 %1600 }
 0x5fe   : > { %v1605_v56 = vsub.f32 %v1592_v49, %v1601_v55  ;;  %v1849_v55 = vsel %vm1283_vm4, %v1061_v54, 0  ;;  %v4140_v54 = vld [vmem:[%s5254_s26 + $0x8] sm:$0xff]  }
 0x600   : > { %v1607_v57 = vmul.f32 1.442695, %v1605_v56  ;;  %v4134_v56 = vld [vmem:[%s4573_s19 + $0x18] sm:$0xff]  }
 0x601   : > { %v1604_v58 = vpop.xlane.xlu0 %1603 }
 0x602   : > { %4197 = vpow2.f32 %v1607_v57  ;;  %v1606_v59 = vsub.f32 %v1595_v52, %v1604_v58  ;;  %v4136_v57 = vld [vmem:[%s4573_s19 + $0x10] sm:$0xff]   ;;  %v4137_v58 = vld [vmem:[%s4573_s19 + $0x8] sm:$0xff]  }
 0x604   : > { %v1609_v60 = vmul.f32 1.442695, %v1606_v59  ;;  %v4138_v59 = vld [vmem:[%s4573_s19] sm:$0xff]  }
 0x606   : > { %4199 = vpow2.f32 %v1609_v60 }
 0x60f   : > { %v4198_v61 = vpop.eup %4197 }
 0x610   : > { %v1611_v62 = vsel %vm1206_vm3, %v4198_v61, 0.0 }
 0x611   : > { %1612 = vadd.xlane.f32.xlu1 %v1611_v62 }
 0x613   : > { %v4200_v63 = vpop.eup %4199 }
 0x614   : > { %v1614_v1 = vsel %vm1206_vm3, %v4200_v63, 0.0 }
 0x615   : > { %1615 = vadd.xlane.f32.xlu0 %v1614_v1 }
 0x622   : > { %1622 = vrot.lane.b32.xlu1 %v4824_v22, %s4503_s16 }
 0x626   : > { %1721 = vrot.lane.b32.xlu1 %v4829_v27, %s4504_s18 }
 0x62b   : > { %1723 = vrot.lane.b32.xlu0 %v4824_v22, %s4504_s18  ;;  %s4508_s18 = smov 32  }
 0x69a   : > { %v1613_v2 = vpop.xlane.xlu1 %1612 }
 0x69b   : > { %4201 = vrcp.f32 %v1613_v2 }
 0x69e   : > { %v1623_v3 = vpop.permute.xlu1 %1622  ;;  %v1616_v4 = vpop.xlane.xlu0 %1615 }
 0x69f   : > { %v1628_v6 = vsel %vm1283_vm4, %v1623_v3, 0  ;;  %4203 = vrcp.f32 %v1616_v4  ;;  %v4135_v3 = vld [vmem:[#allocation2] sm:$0xff]  }
 0x6a0   : > { %3844 = vmatpush3.bf16.msra.mxu0 %v1628_v6 }
 0x6a1   : > { %3855 = vmatprep.subr.bf16.mxu0 %v4497_v0 }
 0x6a2   : > { %v1724_v12 = vpop.permute.xlu0 %1723  ;;  %v1722_v14 = vpop.permute.xlu1 %1721 }
 0x6a3   : > { %v1729_v27 = vsel %vm1206_vm3, %v1724_v12, 0 }
 0x6a8   : > { %v4202_v7 = vpop.eup %4201 }
 0x6a9   : > { %v1619_v9 = vmul.f32 %v4202_v7, %v4198_v61 }
 0x6ac   : > { %v4204_v8 = vpop.eup %4203 }
 0x6ad   : > { %v1620_v10 = vmul.f32 %v4204_v8, %v4200_v63  ;;  %v4133_v63 = vld [vmem:[#allocation2 + $0x8] sm:$0xff]  }
 0x6af   : > { %v1621_v13 = vpack.c.bf16 %v1620_v10, %v1619_v9 }
 0x6b1   : > { %3846 = vmatmul.mubr.msk.bf16.vlgmr.msra.gmra.mxu0 %vm1206_vm3, %v1621_v13 }
 0x6b2   : > { %3856 = vmatpush3.bf16.xpose.msra.mxu0 %v1729_v27  ;;  %3857 = vmatprep.mubr.msk.bf16.mxu0 %vm4498_vm0, %v4497_v0 }
 0x6b3   : > { %3867 = vmatprep.subr.bf16.mxu0 %v4497_v0 }
 0x6b9   : > { %3858 = vmatmul.mubr.msk.bf16.vlgmr.msra.gmra.mxu0 %vm1206_vm3, %v1722_v14 }
 0x6ba   : > { %3869 = vmatprep.mubr.msk.bf16.mxu0 %vm4498_vm0, %v4497_v0  ;;  %3868 = vmatpush3.bf16.msra.mxu0 %v1849_v55 }
 0x6bb   : > { %3885 = vmatprep.subr.bf16.mxu0 %v4497_v0 }
 0x771   : > { %v1664_v17 = vpop.f32.mrf.mxu0 }
 0x773   : > { %v3847_v18 = vpop.f32.mrf.mxu0 }
 0x775   : > { %v1667_v19 = vpop.f32.mrf.mxu0 }
 0x776   : > { %v1671_v20 = vpack.c.bf16 %v1667_v19, %v1664_v17  ;;  %v3602_v17 = vld [vmem:[%s4578_s24] ss:$0 sm:$0xff] }
 0x777   : > { %v3848_v21 = vpop.f32.mrf.mxu0 }
 0x778   : > { %3852 = vmatmul.mubr.msk.bf16.vlgmr.msra.gmra.mxu1 %vm1206_vm3, %v1671_v20 }
 0x779   : > { %v1765_v23 = vpop.f32.mrf.mxu0  ;;  %3863 = vmatprep.mubr.msk.bf16.mxu1 %vm4498_vm0, %v4497_v0 }
 0x77a   : > { %v1772_v24 = vsel %vm1206_vm3, %v1765_v23, -inf }
 0x77b   : > { %1773 = vmax.xlane.f32.xlu1 %v1772_v24  ;;  %v3859_v25 = vpop.f32.mrf.mxu0 }
 0x77d   : > { %v1768_v26 = vpop.f32.mrf.mxu0 }
 0x77e   : > { %v1775_v28 = vsel %vm1206_vm3, %v1768_v26, -inf }
 0x77f   : > { %1776 = vmax.xlane.f32.xlu0 %v1775_v28  ;;  %v3860_v29 = vpop.f32.mrf.mxu0 }
 0x804   : > { %v1774_v30 = vpop.xlane.xlu1 %1773 }
 0x805   : > { %v1778_v31 = vsub.f32 %v1765_v23, %v1774_v30 }
 0x807   : > { %v1780_v32 = vmul.f32 1.442695, %v1778_v31 }
 0x808   : > { %v1777_v33 = vpop.xlane.xlu0 %1776 }
 0x809   : > { %4205 = vpow2.f32 %v1780_v32  ;;  %v1779_v34 = vsub.f32 %v1768_v26, %v1777_v33 }
 0x80b   : > { %v1782_v35 = vmul.f32 1.442695, %v1779_v34 }
 0x80d   : > { %4207 = vpow2.f32 %v1782_v35 }
 0x816   : > { %v4206_v36 = vpop.eup %4205 }
 0x817   : > { %v1784_v37 = vsel %vm1206_vm3, %v4206_v36, 0.0 }
 0x818   : > { %1785 = vadd.xlane.f32.xlu0 %v1784_v37 }
 0x81a   : > { %v4208_v38 = vpop.eup %4207 }
 0x81b   : > { %v1787_v39 = vsel %vm1206_vm3, %v4208_v38, 0.0 }
 0x81c   : > { %1788 = vadd.xlane.f32.xlu1 %v1787_v39 }
 0x82e   : > { %1795 = vrot.lane.b32.xlu0 %v4824_v22, %s4505_s22  ;;  %s5256_s22 = sld [smem:[#allocation19_spill]] }
 0x838   : > { %v1712_v40 = vpop.f32.mrf.mxu1 }
 0x839   : > { %v1719_v41 = vadd.f32 %v1712_v40, %v4884_v44 }
 0x83a   : > { %v3853_v42 = vpop.f32.mrf.mxu1 }
 0x83c   : > { %v1715_v43 = vpop.f32.mrf.mxu1 }
 0x83d   : > { %v1720_v45 = vadd.f32 %v1715_v43, %v4886_v47 }
 0x83e   : > { %v3854_v46 = vpop.f32.mrf.mxu1 }
 0x8a1   : > { %v1786_v48 = vpop.xlane.xlu0 %1785 }
 0x8a2   : > { %4209 = vrcp.f32 %v1786_v48 }
 0x8a5   : > { %v1789_v49 = vpop.xlane.xlu1 %1788  ;;  %v1796_v50 = vpop.permute.xlu0 %1795 }
 0x8a6   : > { %4211 = vrcp.f32 %v1789_v49  ;;  %v1801_v51 = vsel %vm1283_vm4, %v1796_v50, 0 }
 0x8a7   : > { %3862 = vmatpush3.bf16.msra.mxu1 %v1801_v51 }
 0x8a8   : > { %3873 = vmatprep.subr.bf16.mxu1 %v4497_v0 }
 0x8af   : > { %v4210_v22 = vpop.eup %4209 }
 0x8b0   : > { %v1792_v52 = vmul.f32 %v4210_v22, %v4206_v36 }
 0x8b3   : > { %v4212_v44 = vpop.eup %4211 }
 0x8b4   : > { %v1793_v53 = vmul.f32 %v4212_v44, %v4208_v38 }
 0x8b6   : > { %v1794_v47 = vpack.c.bf16 %v1793_v53, %v1792_v52 }
 0x8b8   : > { %3864 = vmatmul.mubr.msk.bf16.vlgmr.msra.gmra.mxu1 %vm1206_vm3, %v1794_v47 }
 0x8b9   : > { %3881 = vmatprep.mubr.msk.bf16.mxu1 %vm4498_vm0, %v4497_v0  ;;  %3874 = vmatpush3.bf16.msra.mxu1 %v4134_v56 }
 0x8ba   : > { %3875 = vmatprep.subr.bf16.mxu1 %v4497_v0 }
 0x8bd   : > { %3876 = vmatpush3.bf16.msra.mxu1 %v4136_v57 }
 0x8be   : > { %3877 = vmatprep.subr.bf16.mxu1 %v4497_v0 }
 0x8c1   : > { %3878 = vmatpush3.bf16.msra.mxu1 %v4137_v58 }
 0x8c2   : > { %3879 = vmatprep.subr.bf16.mxu1 %v4497_v0 }
 0x8c5   : > { %3880 = vmatpush3.bf16.msra.mxu1 %v4138_v59 }
 0x8c6   : > { %3899 = vmatprep.subr.bf16.mxu1 %v4497_v0 }
 0x8c8   : > { %3882 = vmatmul.mubr.msk.bf16.vlgmr.msra.gmra.mxu1 %vm1160_vm2, %v4815_v11 }
 0x8c9   : > { %3901 = vmatprep.mubr.msk.bf16.mxu1 %vm4498_vm0, %v4497_v0 }
 0x978   : > { %v1837_v60 = vpop.f32.mrf.mxu1 }
 0x97a   : > { %v3865_v61 = vpop.f32.mrf.mxu1 }
 0x97c   : > { %v1840_v62 = vpop.f32.mrf.mxu1 }
 0x97d   : > { %v1844_v1 = vpack.c.bf16 %v1840_v62, %v1837_v60 }
 0x97e   : > { %v3866_v2 = vpop.f32.mrf.mxu1 }
 0x97f   : > { %3870 = vmatmul.mubr.msk.bf16.vlgmr.msra.gmra.mxu0 %vm1206_vm3, %v1844_v1 }
 0x980   : > { %3886 = vmatpush3.bf16.msra.mxu0 %v4133_v63  ;;  %3889 = vmatprep.mubr.msk.bf16.mxu0 %vm4498_vm0, %v4497_v0 }
 0x981   : > { %3887 = vmatprep.subr.bf16.mxu0 %v4497_v0 }
 0x984   : > { %3888 = vmatpush3.bf16.msra.mxu0 %v4135_v3 }
 0x985   : > { %3893 = vmatprep.subr.bf16.mxu0 %v4497_v0 }
 0x987   : > { %3890 = vmatmul.mubr.msk.bf16.vlgmr.msra.gmra.mxu0 %vm1085_vm1, %v4797_v5 }
 0x988   : > { %3895 = vmatprep.mubr.msk.bf16.mxu0 %vm4498_vm0, %v4497_v0  ;;  %v2036_v11 = vpop.f32.mrf.mxu1 }
 0x989   : > { %v2037_v20 = vadd.f32 %v3602_v17, %v2036_v11 }
 0x98a   : > { %v3883_v4 = vpop.f32.mrf.mxu1 }
 0x98b   : > { %v4958_v24 = vpack.c.bf16 %v2037_v20, %v2037_v20 }
 0x98c   : > { %v2039_v6 = vpop.f32.mrf.mxu1 }
 0x98e   : > { %v3884_v7 = vpop.f32.mrf.mxu1 }
 0xa3f   : > { %v1885_v8 = vpop.f32.mrf.mxu0 }
 0xa40   : > { %v4948_v9 = vadd.f32 %v1885_v8, %v1719_v41 }
 0xa41   : > { %v3871_v10 = vpop.f32.mrf.mxu0 }
 0xa43   : > { %v1888_v12 = vpop.f32.mrf.mxu0 }
 0xa44   : > { %v4950_v13 = vadd.f32 %v1888_v12, %v1720_v45 }
 0xa45   : > { %v3872_v27 = vpop.f32.mrf.mxu0 }
 0xa47   : > { %v2094_v14 = vpop.f32.mrf.mxu0 }
 0xa48   : > { %v2095_v18 = vadd.f32 %v3608_v15, %v2094_v14 }
 0xa49   : > { %v3891_v16 = vpop.f32.mrf.mxu0 }
 0xa4b   : > { %v2097_v5 = vpop.f32.mrf.mxu0 }
 0xa4c   : > { %v2098_v19 = vadd.f32 %v3608_v15, %v2097_v5 }
 0xa4d   : > { %v3892_v21 = vpop.f32.mrf.mxu0 }
 0xa4e   : > { %v4954_v23 = vpack.c.bf16 %v2098_v19, %v2095_v18 }
 0xa50   : > { %2213 = vrot.lane.b32.xlu1 %v4954_v23, %s4502_s11  ;;  %v2108_v25 = vsel %vm2103_vm5, %v4954_v23, 0 }
 0xa51   : > { %3894 = vmatpush3.bf16.xpose.msra.mxu0 %v2108_v25 }
 0xa52   : > { %3905 = vmatprep.subr.bf16.mxu0 %v4497_v0 }
 0xa54   : > { %2211 = vrot.lane.b32.xlu1 %v4958_v24, %s4502_s11  ;;  %s5255_s11 = smov %s5254_s26  ;;  %s5260_s26 = sld [smem:[#allocation21_spill]] }
 0xa55   : > { %v4139_v59 = vld [vmem:[%s5255_s11] sm:$0xff]  }
 0xa58   : > { %3896 = vmatmul.mubr.msk.bf16.vlgmr.msra.gmra.mxu0 %vm2103_vm5, %v4958_v24 }
 0xa59   : > { %3907 = vmatprep.mubr.msk.bf16.mxu0 %vm4498_vm0, %v4497_v0 }
 0xac2   : > { %v2214_v26 = vpop.permute.xlu1 %2213 }
 0xac3   : > { %v2219_v28 = vsel %vm2103_vm5, %v2214_v26, 0 }
 0xac4   : > { %3906 = vmatpush3.bf16.xpose.msra.mxu0 %v2219_v28 }
 0xac5   : > { %3917 = vmatprep.subr.bf16.mxu0 %v4497_v0 }
 0xac6   : > { %v2212_v29 = vpop.permute.xlu1 %2211 }
 0xacb   : > { %3908 = vmatmul.mubr.msk.bf16.vlgmr.msra.gmra.mxu0 %vm2103_vm5, %v2212_v29 }
 0xacc   : > { %3919 = vmatprep.mubr.msk.bf16.mxu0 %vm4498_vm0, %v4497_v0  ;;  %3918 = vmatpush3.bf16.msra.mxu0 %v4140_v54 }
 0xacd   : > { %3929 = vmatprep.subr.bf16.mxu0 %v4497_v0 }
 0xb18   : > { %v2144_v30 = vpop.f32.mrf.mxu0 }
 0xb19   : > { %v2150_v31 = vsel %vm2103_vm5, %v2144_v30, -inf }
 0xb1a   : > { %2151 = vmax.xlane.f32.xlu0 %v2150_v31  ;;  %v3897_v32 = vpop.f32.mrf.mxu0 }
 0xb1c   : > { %v2147_v33 = vpop.f32.mrf.mxu0 }
 0xb1e   : > { %v3898_v34 = vpop.f32.mrf.mxu0 }
 0xb8b   : > { %v2255_v35 = vpop.f32.mrf.mxu0 }
 0xb8c   : > { %v2261_v36 = vsel %vm2103_vm5, %v2255_v35, -inf }
 0xb8d   : > { %2262 = vmax.xlane.f32.xlu1 %v2261_v36  ;;  %v3909_v37 = vpop.f32.mrf.mxu0 }
 0xb8f   : > { %v2258_v38 = vpop.f32.mrf.mxu0 }
 0xb91   : > { %v3910_v39 = vpop.f32.mrf.mxu0 }
 0xb9e   : > { %2163 = vrot.lane.b32.xlu1 %v4954_v23, %s4506_s2  ;;  %s5259_s2 = sld [smem:[#allocation32_spill]] }
 0xba2   : > { %2420 = vrot.lane.b32.xlu1 %v4954_v23, %s4501_s1 }
 0xba3   : > { %v2152_v40 = vpop.xlane.xlu0 %2151 }
 0xba4   : > { %v2153_v41 = vsub.f32 %v2144_v30, %v2152_v40 }
 0xba6   : > { %v2154_v42 = vmul.f32 1.442695, %v2153_v41  ;;  %2418 = vrot.lane.b32.xlu1 %v4958_v24, %s4501_s1  ;;  %s4507_s1 = smov 48   ;;  %v4141_v41 = vld [vmem:[%s5255_s11 + $0x10] sm:$0xff]  }
 0xba8   : > { %4213 = vpow2.f32 %v2154_v42 }
 0xbb5   : > { %v4214_v43 = vpop.eup %4213 }
 0xbb6   : > { %v2156_v45 = vsel %vm2103_vm5, %v4214_v43, 0.0 }
 0xbb7   : > { %2157 = vadd.xlane.f32.xlu0 %v2156_v45  ;;  %v3599_v45 = vld [vmem:[%s5256_s22] ss:$0 sm:$0xff]  ;;  %s5263_s22 = sld [smem:[#allocation26_spill]] }
 0xc16   : > { %v2263_v46 = vpop.xlane.xlu1 %2262 }
 0xc17   : > { %v2264_v48 = vsub.f32 %v2255_v35, %v2263_v46 }
 0xc19   : > { %v2265_v49 = vmul.f32 1.442695, %v2264_v48 }
 0xc1a   : > { %v2164_v50 = vpop.permute.xlu1 %2163 }
 0xc1b   : > { %4215 = vpow2.f32 %v2265_v49  ;;  %3900 = vmatpush3.bf16.msra.mxu1 %v2164_v50  ;;  %v1900_v49 = vadd.f32 %v3599_v45, %v4948_v9 }
 0xc1c   : > { %3911 = vmatprep.subr.bf16.mxu1 %v4497_v0 }
 0xc1e   : > { %v2421_v3 = vpop.permute.xlu1 %2420 }
 0xc1f   : > { %v2426_v7 = vsel %vm2103_vm5, %v2421_v3, 0 }
 0xc22   : > { %v2419_v12 = vpop.permute.xlu1 %2418 }
 0xc28   : > { %v4216_v51 = vpop.eup %4215 }
 0xc29   : > { %v2267_v22 = vsel %vm2103_vm5, %v4216_v51, 0.0 }
 0xc2a   : > { %2268 = vadd.xlane.f32.xlu0 %v2267_v22  ;;  %v1901_v22 = vadd.f32 %v3599_v45, %v4950_v13 }
 0xc40   : > { %v2158_v44 = vpop.xlane.xlu0 %2157  ;;  %2273 = vrot.lane.b32.xlu0 %v4954_v23, %s4507_s1  ;;  %s5261_s1 = sld [smem:[#allocation28_spill]] }
 0xc41   : > { %4217 = vrcp.f32 %v2158_v44 }
 0xc4e   : > { %v4218_v52 = vpop.eup %4217 }
 0xc4f   : > { %v2160_v53 = vmul.f32 %v4218_v52, %v4214_v43  ;;  %v4249_v52 = vld [vmem:[%s4790_s10] sm:$0xff] }
 0xc51   : > { %v2161_v47 = vpack.c.bf16 %v2160_v53, %v2160_v53  ;;  %v1902_v53 = vadd.f32 %v4249_v52, %v1900_v49 }
 0xc53   : > { %3902 = vmatmul.mubr.msk.bf16.vlgmr.msra.gmra.mxu1 %vm2103_vm5, %v2161_v47 }
 0xc54   : > { %3913 = vmatprep.mubr.msk.bf16.mxu1 %vm4498_vm0, %v4497_v0 }
 0xcb3   : > { %v2269_v55 = vpop.xlane.xlu0 %2268 }
 0xcb4   : > { %4219 = vrcp.f32 %v2269_v55  ;;  %v1904_v55 = vsel %vm1085_vm1, %v1902_v53, 0.0 }
 0xcb7   : > { %v2274_v56 = vpop.permute.xlu0 %2273 }
 0xcb8   : > { %3912 = vmatpush3.bf16.msra.mxu1 %v2274_v56  ;;  %v4250_v56 = vld [vmem:[%s4790_s10 + $0x8] sm:$0xff]  ;;  %s5257_s10 = sld [smem:[#allocation24_spill]] }
 0xcb9   : > { %3923 = vmatprep.subr.bf16.mxu1 %v4497_v0 }
 0xcc1   : > { %v4220_v57 = vpop.eup %4219 }
 0xcc2   : > { %v2271_v58 = vmul.f32 %v4220_v57, %v4216_v51  ;;  %v1903_v57 = vadd.f32 %v4250_v56, %v1901_v22 }
 0xcc4   : > { %v2272_v60 = vpack.c.bf16 %v2271_v58, %v2271_v58  ;;  %v1907_v9 = vsel %vm1085_vm1, %v1903_v57, 0.0 }
 0xcc6   : > { %3914 = vmatmul.mubr.msk.bf16.vlgmr.msra.gmra.mxu1 %vm2103_vm5, %v2272_v60 }
 0xcc7   : > { %3924 = vmatpush3.bf16.msra.mxu1 %v4139_v59  ;;  %3925 = vmatprep.mubr.msk.bf16.mxu1 %vm4498_vm0, %v4497_v0 }
 0xcc8   : > { %3935 = vmatprep.subr.bf16.mxu1 %v4497_v0 }
 0xd13   : > { %v2203_v61 = vpop.f32.mrf.mxu1 }
 0xd14   : > { %v2209_v62 = vpack.c.bf16 %v2203_v61, %v2203_v61 }
 0xd15   : > { %v3903_v63 = vpop.f32.mrf.mxu1 }
 0xd16   : > { %3926 = vmatmul.mubr.msk.bf16.vlgmr.msra.gmra.mxu1 %vm2103_vm5, %v2209_v62 }
 0xd17   : > { %v2206_v1 = vpop.f32.mrf.mxu1  ;;  %3937 = vmatprep.mubr.msk.bf16.mxu1 %vm4498_vm0, %v4497_v0 }
 0xd19   : > { %v3904_v2 = vpop.f32.mrf.mxu1 }
 0xd1a   : > { %v4142_v2 = vld [vmem:[%s5255_s11 + $0x18] sm:$0xff]  }
 0xd86   : > { %v2313_v11 = vpop.f32.mrf.mxu1 }
 0xd87   : > { %v2319_v4 = vpack.c.bf16 %v2313_v11, %v2313_v11 }
 0xd88   : > { %v3915_v6 = vpop.f32.mrf.mxu1 }
 0xd89   : > { %3920 = vmatmul.mubr.msk.bf16.vlgmr.msra.gmra.mxu0 %vm2103_vm5, %v2319_v4 }
 0xd8a   : > { %3930 = vmatpush3.bf16.xpose.msra.mxu0 %v2426_v7  ;;  %v2316_v8 = vpop.f32.mrf.mxu1  ;;  %3931 = vmatprep.mubr.msk.bf16.mxu0 %vm4498_vm0, %v4497_v0 }
 0xd8b   : > { %3941 = vmatprep.subr.bf16.mxu0 %v4497_v0 }
 0xd8c   : > { %v3916_v10 = vpop.f32.mrf.mxu1 }
 0xd91   : > { %3932 = vmatmul.mubr.msk.bf16.vlgmr.msra.gmra.mxu0 %vm2103_vm5, %v2419_v12 }
 0xd92   : > { %3943 = vmatprep.mubr.msk.bf16.mxu0 %vm4498_vm0, %v4497_v0  ;;  %3942 = vmatpush3.bf16.msra.mxu0 %v4141_v41  ;;  %v4144_v41 = vld [vmem:[#allocation5] sm:$0xff]  }
 0xd93   : > { %3953 = vmatprep.subr.bf16.mxu0 %v4497_v0 }
 0xdd6   : > { %v5007_v27 = vpop.f32.mrf.mxu1 }
 0xdd8   : > { %v3927_v14 = vpop.f32.mrf.mxu1 }
 0xdda   : > { %v2415_v15 = vpop.f32.mrf.mxu1 }
 0xddc   : > { %v3928_v16 = vpop.f32.mrf.mxu1 }
 0xe49   : > { %v5009_v17 = vpop.f32.mrf.mxu0 }
 0xe4a   : > { %v2413_v63 = vadd.f32 %v5007_v27, %v5009_v17 }
 0xe4b   : > { %v3921_v5 = vpop.f32.mrf.mxu0 }
 0xe4d   : > { %v2366_v18 = vpop.f32.mrf.mxu0 }
 0xe4f   : > { %v3922_v19 = vpop.f32.mrf.mxu0 }
 0xe51   : > { %v2462_v20 = vpop.f32.mrf.mxu0 }
 0xe52   : > { %v2468_v21 = vsel %vm2103_vm5, %v2462_v20, -inf }
 0xe53   : > { %2469 = vmax.xlane.f32.xlu0 %v2468_v21  ;;  %v3933_v25 = vpop.f32.mrf.mxu0 }
 0xe55   : > { %v2465_v26 = vpop.f32.mrf.mxu0 }
 0xe57   : > { %v3934_v28 = vpop.f32.mrf.mxu0 }
 0xe69   : > { %2480 = vrot.lane.b32.xlu0 %v4954_v23, %s4508_s18  ;;  %s5262_s18 = sld [smem:[#allocation25_spill]] }
 0xe6d   : > { %2577 = vrot.lane.b32.xlu0 %v4958_v24, %s4503_s16 }
 0xedc   : > { %v2470_v29 = vpop.xlane.xlu0 %2469 }
 0xedd   : > { %v2471_v30 = vsub.f32 %v2462_v20, %v2470_v29  ;;  %v3628_v20 = vld [vmem:[%s5257_s10] ss:$0 sm:$0xff]  ;;  %s5265_s10 = sld [smem:[#allocation34_spill]] }
 0xedf   : > { %v2472_v31 = vmul.f32 1.442695, %v2471_v30 }
 0xee0   : > { %v2481_v32 = vpop.permute.xlu0 %2480 }
 0xee1   : > { %4221 = vpow2.f32 %v2472_v31  ;;  %3936 = vmatpush3.bf16.msra.mxu1 %v2481_v32  ;;  %v4251_v32 = vld [vmem:[%s4809_s7] sm:$0xff]  ;;  %s5258_s7 = sld [smem:[#allocation20_spill]] }
 0xee2   : > { %3947 = vmatprep.subr.bf16.mxu1 %v4497_v0 }
 0xee4   : > { %v2578_v40 = vpop.permute.xlu0 %2577 }
 0xeee   : > { %v4222_v33 = vpop.eup %4221 }
 0xeef   : > { %v2474_v34 = vsel %vm2103_vm5, %v4222_v33, 0.0 }
 0xef0   : > { %2475 = vadd.xlane.f32.xlu1 %v2474_v34 }
 0xf01   : > { %2579 = vrot.lane.b32.xlu1 %v4954_v23, %s4503_s16  ;;  %s4509_s16 = smov 16  }
 0xf79   : > { %v2476_v35 = vpop.xlane.xlu1 %2475 }
 0xf7a   : > { %4223 = vrcp.f32 %v2476_v35 }
 0xf7d   : > { %v2580_v37 = vpop.permute.xlu1 %2579 }
 0xf7e   : > { %v2585_v39 = vsel %vm2103_vm5, %v2580_v37, 0 }
 0xf87   : > { %v4224_v36 = vpop.eup %4223 }
 0xf88   : > { %v2478_v24 = vmul.f32 %v4224_v36, %v4222_v33 }
 0xf8a   : > { %v2479_v38 = vpack.c.bf16 %v2478_v24, %v2478_v24 }
 0xf8c   : > { %3938 = vmatmul.mubr.msk.bf16.vlgmr.msra.gmra.mxu1 %vm2103_vm5, %v2479_v38 }
 0xf8d   : > { %3948 = vmatpush3.bf16.xpose.msra.mxu1 %v2585_v39  ;;  %3949 = vmatprep.mubr.msk.bf16.mxu1 %vm4498_vm0, %v4497_v0 }
 0xf8e   : > { %3959 = vmatprep.subr.bf16.mxu1 %v4497_v0 }
 0xf94   : > { %3950 = vmatmul.mubr.msk.bf16.vlgmr.msra.gmra.mxu1 %vm2103_vm5, %v2578_v40  ;;  %v4143_v40 = vld [vmem:[#allocation5 + $0x8] sm:$0xff]  }
 0xf95   : > { %3961 = vmatprep.mubr.msk.bf16.mxu1 %vm4498_vm0, %v4497_v0  ;;  %3960 = vmatpush3.bf16.msra.mxu1 %v4142_v2  ;;  %v4153_v2 = vld [vmem:[%s5259_s2 + $0x14] ss:$8 sps:$4 sm:$0xff]  }
 0xf96   : > { %3973 = vmatprep.subr.bf16.mxu1 %v4497_v0 }
0x104c   : > { %v2520_v42 = vpop.f32.mrf.mxu1 }
0x104d   : > { %v2526_v43 = vpack.c.bf16 %v2520_v42, %v2520_v42 }
0x104e   : > { %v3939_v46 = vpop.f32.mrf.mxu1 }
0x104f   : > { %3944 = vmatmul.mubr.msk.bf16.vlgmr.msra.gmra.mxu0 %vm2103_vm5, %v2526_v43 }
0x1050   : > { %v2523_v48 = vpop.f32.mrf.mxu1  ;;  %3955 = vmatprep.mubr.msk.bf16.mxu0 %vm4498_vm0, %v4497_v0 }
0x1052   : > { %v3940_v50 = vpop.f32.mrf.mxu1 }
0x1054   : > { %v2621_v51 = vpop.f32.mrf.mxu1 }
0x1055   : > { %v2627_v44 = vsel %vm2103_vm5, %v2621_v51, -inf }
0x1056   : > { %2628 = vmax.xlane.f32.xlu1 %v2627_v44  ;;  %v3951_v47 = vpop.f32.mrf.mxu1 }
0x1058   : > { %v2624_v54 = vpop.f32.mrf.mxu1 }
0x1059   : > { %v3600_v54 = vld [vmem:[%s5258_s7] ss:$0 sm:$0xff]  ;;  %s5266_s7 = sld [smem:[#allocation33_spill]] }
0x105a   : > { %1905 = vadd.xlane.f32.xlu1 %v1904_v55  ;;  %v3952_v58 = vpop.f32.mrf.mxu1 }
0x105b   : > { %v4147_v58 = vld [vmem:[%s5259_s2 + $0x34] ss:$8 sps:$4 sm:$0xff]  }
0x105e   : > { %1908 = vadd.xlane.f32.xlu1 %v1907_v9  ;;  %v3601_v9 = vld [vmem:[%s5260_s26] ss:$0 sm:$0xff]  ;;  %s5267_s26 = sld [smem:[#allocation29_spill]] }
0x10df   : > { %v2629_v59 = vpop.xlane.xlu1 %2628 }
0x10e0   : > { %v2630_v60 = vsub.f32 %v2621_v51, %v2629_v59 }
0x10e2   : > { %v2631_v13 = vmul.f32 1.442695, %v2630_v60 }
0x10e3   : > { %v1906_v5 = vpop.xlane.xlu1 %1905 }
0x10e4   : > { %4225 = vpow2.f32 %v2631_v13  ;;  %v1911_v18 = vmul.f32 0.03125, %v1906_v5 }
0x10e6   : > { %v1913_v28 = vsub.f32 %v1902_v53, %v1911_v18 }
0x10e7   : > { %v1909_v19 = vpop.xlane.xlu1 %1908 }
0x10e8   : > { %v1912_v29 = vmul.f32 0.03125, %v1909_v19  ;;  %v1915_v24 = vmul.f32 %v1913_v28, %v1913_v28  ;;  %v3629_v19 = vld [vmem:[%s5262_s18] ss:$0 sm:$0xff]  ;;  %s5268_s18 = sld [smem:[#allocation30_spill]] }
0x10ea   : > { %v1914_v35 = vsub.f32 %v1903_v57, %v1912_v29  ;;  %v1917_v37 = vsel %vm1085_vm1, %v1915_v24, 0.0 }
0x10ec   : > { %v1916_v38 = vmul.f32 %v1914_v35, %v1914_v35 }
0x10ee   : > { %v1920_v39 = vsel %vm1085_vm1, %v1916_v38, 0.0 }
0x10f1   : > { %v4226_v61 = vpop.eup %4225 }
0x10f2   : > { %v2633_v62 = vsel %vm2103_vm5, %v4226_v61, 0.0 }
0x10f3   : > { %2634 = vadd.xlane.f32.xlu0 %v2633_v62 }
0x1109   : > { %2639 = vrot.lane.b32.xlu0 %v4954_v23, %s4509_s16  ;;  %s5264_s16 = sld [smem:[#allocation27_spill]] }
0x110f   : > { %v2570_v1 = vpop.f32.mrf.mxu0 }
0x1110   : > { %v2576_v3 = vadd.f32 %v2570_v1, %v2413_v63  ;;  %v4150_v63 = vld [vmem:[%s5259_s2 + $0x24] ss:$8 sps:$4 sm:$0xff]   ;;  %v4148_v1 = vld [vmem:[%s5259_s2 + $0x20] ss:$8 sps:$4 sm:$0xff]  }
0x1111   : > { %v3945_v11 = vpop.f32.mrf.mxu0 }
0x1112   : > { %v4151_v11 = vld [vmem:[%s5259_s2 + $0x10] ss:$8 sps:$4 sm:$0xff]  }
0x1113   : > { %v2573_v4 = vpop.f32.mrf.mxu0 }
0x1114   : > { %v4156_v4 = vld [vmem:[%s5259_s2 + $0x4] ss:$8 sps:$4 sm:$0xff]  }
0x1115   : > { %v3946_v6 = vpop.f32.mrf.mxu0 }
0x1116   : > { %v4154_v6 = vld [vmem:[%s5259_s2] ss:$8 sps:$4 sm:$0xff]  }
0x117c   : > { %v2635_v7 = vpop.xlane.xlu0 %2634 }
0x117d   : > { %4227 = vrcp.f32 %v2635_v7  ;;  %v4157_v7 = vld [vmem:[%s5261_s1 + $0x38] sm:$0xff]  }
0x1180   : > { %v2640_v8 = vpop.permute.xlu0 %2639 }
0x1181   : > { %3954 = vmatpush3.bf16.msra.mxu0 %v2640_v8  ;;  %v4158_v8 = vld [vmem:[%s5261_s1 + $0x30] sm:$0xff]  }
0x1182   : > { %3965 = vmatprep.subr.bf16.mxu0 %v4497_v0 }
0x118a   : > { %v4228_v23 = vpop.eup %4227 }
0x118b   : > { %v2637_v10 = vmul.f32 %v4228_v23, %v4226_v61  ;;  %v4145_v61 = vld [vmem:[%s5259_s2 + $0x30] ss:$8 sps:$4 sm:$0xff]   ;;  %v4159_v23 = vld [vmem:[%s5261_s1 + $0x28] sm:$0xff]  }
0x118d   : > { %v2638_v12 = vpack.c.bf16 %v2637_v10, %v2637_v10  ;;  %v4160_v10 = vld [vmem:[%s5261_s1 + $0x20] sm:$0xff]  }
0x118f   : > { %3956 = vmatmul.mubr.msk.bf16.vlgmr.msra.gmra.mxu0 %vm2103_vm5, %v2638_v12  ;;  %v4161_v12 = vld [vmem:[%s5261_s1 + $0x18] sm:$0xff]  }
0x1190   : > { %3969 = vmatprep.mubr.msk.bf16.mxu0 %vm4498_vm0, %v4497_v0  ;;  %3966 = vmatpush3.bf16.msra.mxu0 %v4143_v40 }
0x1191   : > { %3967 = vmatprep.subr.bf16.mxu0 %v4497_v0 }
0x1194   : > { %3968 = vmatpush3.bf16.msra.mxu0 %v4144_v41 }
0x1195   : > { %3124 = vmatprep.subr.bf16.mxu0 %v4147_v58 }
0x124f   : > { %v2679_v27 = vpop.f32.mrf.mxu0 }
0x1250   : > { %v2685_v14 = vpack.c.bf16 %v2679_v27, %v2679_v27  ;;  %v4162_v27 = vld [vmem:[%s5261_s1 + $0x10] sm:$0xff]  }
0x1251   : > { %v3957_v15 = vpop.f32.mrf.mxu0 }
0x1252   : > { %3962 = vmatmul.mubr.msk.bf16.vlgmr.msra.gmra.mxu1 %vm2103_vm5, %v2685_v14  ;;  %v4163_v14 = vld [vmem:[%s5261_s1 + $0x8] sm:$0xff]   ;;  %v4164_v15 = vld [vmem:[%s5261_s1] sm:$0xff]  }
0x1253   : > { %v2682_v16 = vpop.f32.mrf.mxu0  ;;  %3989 = vmatprep.mubr.msk.bf16.mxu1 %vm4498_vm0, %v4497_v0  ;;  %3974 = vmatpush3.bf16.msra.mxu1 %v4157_v7 }
0x1254   : > { %3975 = vmatprep.subr.bf16.mxu1 %v4497_v0 }
0x1255   : > { %v3958_v17 = vpop.f32.mrf.mxu0 }
0x1257   : > { %3976 = vmatpush3.bf16.msra.mxu1 %v4158_v8  ;;  %v3025_v8 = vld [vmem:[%s5266_s7] sm:$0x3] }
0x1258   : > { %3977 = vmatprep.subr.bf16.mxu1 %v4497_v0 }
0x125b   : > { %3978 = vmatpush3.bf16.msra.mxu1 %v4159_v23 }
0x125c   : > { %3979 = vmatprep.subr.bf16.mxu1 %v4497_v0 }
0x125f   : > { %3980 = vmatpush3.bf16.msra.mxu1 %v4160_v10 }
0x1260   : > { %3981 = vmatprep.subr.bf16.mxu1 %v4497_v0 }
0x1263   : > { %3982 = vmatpush3.bf16.msra.mxu1 %v4161_v12 }
0x1264   : > { %3983 = vmatprep.subr.bf16.mxu1 %v4497_v0 }
0x1267   : > { %3984 = vmatpush3.bf16.msra.mxu1 %v4162_v27 }
0x1268   : > { %3985 = vmatprep.subr.bf16.mxu1 %v4497_v0 }
0x126b   : > { %3986 = vmatpush3.bf16.msra.mxu1 %v4163_v14 }
0x126c   : > { %3987 = vmatprep.subr.bf16.mxu1 %v4497_v0  ;;  %v3631_v0 = vld [vmem:[%s5264_s16] ss:$0 sm:$0xff] }
0x126f   : > { %3988 = vmatpush3.bf16.msra.mxu1 %v4164_v15 }
0x1312   : > { %v2729_v21 = vpop.f32.mrf.mxu1 }
0x1313   : > { %v2735_v25 = vadd.f32 %v2729_v21, %v2576_v3  ;;  %v4510_v3 = vmov 0   ;;  %v3630_v21 = vld [vmem:[%s5263_s22] ss:$0 sm:$0xff]  ;;  %s5137_s22 = sand.u32 1, %s4450_s23  }
0x1314   : > { %v3963_v26 = vpop.f32.mrf.mxu1  ;;  %s3572_s16 = sshll.u32 %s5137_s22, 4  ;;  %s3351_s2 = scalar_lea.sflag [#allocation4], %s5137_s22 }
0x1315   : > { %v2742_v30 = vadd.f32 %v3628_v20, %v2735_v25  ;;  %s1023_s7 = scalar_lea.vmem [#allocation10], %s3572_s16  ;;  %s4511_s16 = smov [#allocation10]  }
0x1316   : > { %v2732_v31 = vpop.f32.mrf.mxu1  ;;  %s4360_s5 = sshll.u32 %s4511_s16, 4  ;;  %s4361_s5 = int_to_ptr.vmem [resolvable:$false] %s4360_s5 }
0x1317   : > { %v2743_v33 = vadd.f32 %v4251_v32, %v2742_v30  ;;  %s4362_s6 = scalar_lea.vmem %s4361_s5, 512 }
0x1318   : > { %v3964_v34 = vpop.f32.mrf.mxu1 }
0x1319   : > { %v2744_v36 = vsel %vm1160_vm2, %v2743_v33, 0.0 }
0x131a   : > { %2745 = vadd.xlane.f32.xlu1 %v2744_v36 }
0x131e   : > { %1918 = vadd.xlane.f32.xlu1 %v1917_v37 }
0x1322   : > { %1921 = vadd.xlane.f32.xlu1 %v1920_v39 }
0x13a3   : > { %v2746_v42 = vpop.xlane.xlu1 %2745 }
0x13a4   : > { %v2748_v43 = vmul.f32 0.015625, %v2746_v42  ;;  %v4165_v42 = vld [vmem:[%s5265_s10 + $0x78] sm:$0xff]  }
0x13a6   : > { %v5059_v45 = vsub.f32 %v2743_v33, %v2748_v43 }
0x13a7   : > { %v1919_v46 = vpop.xlane.xlu1 %1918 }
0x13a8   : > { %v1923_v48 = vmul.f32 0.03125, %v1919_v46  ;;  %v2750_v49 = vmul.f32 %v5059_v45, %v5059_v45 }
0x13aa   : > { %v1925_v50 = vadd.f32 1e-05, %v1923_v48  ;;  %v2751_v51 = vsel %vm1160_vm2, %v2750_v49, 0.0  ;;  %v4167_v48 = vld [vmem:[%s5265_s10 + $0x70] sm:$0xff]  }
0x13ab   : > { %2752 = vadd.xlane.f32.xlu1 %v2751_v51  ;;  %v1922_v22 = vpop.xlane.xlu1 %1921  ;;  %v4168_v49 = vld [vmem:[%s5265_s10 + $0x30] sm:$0xff]   ;;  %v4170_v51 = vld [vmem:[%s5265_s10 + $0x28] sm:$0xff]  }
0x13ac   : > { %4229 = vrsqrt.f32 %v1925_v50  ;;  %v1924_v44 = vmul.f32 0.03125, %v1922_v22  ;;  %v4169_v50 = vld [vmem:[%s5265_s10 + $0x68] sm:$0xff]   ;;  %v4171_v22 = vld [vmem:[%s5265_s10 + $0x60] sm:$0xff]  }
0x13ae   : > { %v1926_v52 = vadd.f32 1e-05, %v1924_v44  ;;  %v4172_v44 = vld [vmem:[%s5265_s10 + $0x20] sm:$0xff]  }
0x13b0   : > { %4231 = vrsqrt.f32 %v1926_v52  ;;  %v4173_v52 = vld [vmem:[%s5265_s10 + $0x58] sm:$0xff]  }
0x13b9   : > { %v4230_v53 = vpop.eup %4229 }
0x13ba   : > { %v1929_v47 = vmul.f32 %v4230_v53, %v1913_v28 }
0x13bc   : > { %v1937_v57 = vmul.f32 %v3600_v54, %v1929_v47  ;;  %v4174_v47 = vld [vmem:[%s5265_s10 + $0x18] sm:$0xff]  }
0x13bd   : > { %v4232_v55 = vpop.eup %4231 }
0x13be   : > { %v1930_v56 = vmul.f32 %v4232_v55, %v1914_v35  ;;  %v5067_v60 = vadd.f32 %v3601_v9, %v1937_v57 }
0x13c0   : > { %v1938_v59 = vmul.f32 %v3600_v54, %v1930_v56  ;;  %v4175_v54 = vld [vmem:[%s5265_s10 + $0x50] sm:$0xff]  }
0x13c2   : > { %v5069_v13 = vadd.f32 %v3601_v9, %v1938_v59  ;;  %v4176_v59 = vld [vmem:[%s5265_s10 + $0x10] sm:$0xff]  }
0x13c4   : > { %v2796_v62 = vpack.c.bf16 %v5069_v13, %v5067_v60 }
0x13c6   : > { %3970 = vmatmul.mubr.msk.bf16.vlgmr.msra.gmra.mxu0 %vm1085_vm1, %v2796_v62 }
0x13c7   : > { %3125 = vmatpush1.bf16.msra.mxu0 %v4145_v61  ;;  %3148 = vmatprep.mubr.bf16.mxu0 %v4510_v3  ;;  %v4177_v61 = vld [vmem:[%s5265_s10 + $0x48] sm:$0xff]   ;;  %v4179_v3 = vld [vmem:[%s5265_s10 + $0x40] sm:$0xff]  }
0x13c8   : > { %3126 = vmatprep.subr.bf16.mxu0 %v4150_v63 }
0x13cb   : > { %3127 = vmatpush1.bf16.msra.mxu0 %v4148_v1 }
0x13cc   : > { %3128 = vmatprep.subr.bf16.mxu0 %v4153_v2  ;;  %v4178_v2 = vld [vmem:[%s5265_s10 + $0x8] sm:$0xff]  }
0x13cf   : > { %3129 = vmatpush1.bf16.msra.mxu0 %v4151_v11  ;;  %v4180_v11 = vld [vmem:[%s5265_s10] sm:$0xff]  }
0x13d0   : > { %3130 = vmatprep.subr.bf16.mxu0 %v4156_v4  ;;  %v3063_v4 = vlaneseq }
0x13d3   : > { %3131 = vmatpush1.bf16.msra.mxu0 %v4154_v6  ;;  %v3064_v6 = vshrl.u32 %v3063_v4, 7 }
0x13d4   : > { %3759 = vmatprep.subr.bf16.mxu0 %v4165_v42 }
0x13d5   : > { %v3065_v7 = vsub.s32 0, %v3064_v6  ;;  %v3069_v23 = vsub.s32 1, %v3064_v6 }
0x13d7   : > { %v3066_v10 = vrot.slane %v3025_v8, %v3065_v7  ;;  %v3070_v12 = vrot.slane %v3025_v8, %v3069_v23 }
0x1434   : > { %v2753_v16 = vpop.xlane.xlu1 %2752 }
0x1435   : > { %v2754_v17 = vmul.f32 0.015625, %v2753_v16 }
0x1437   : > { %v2755_v5 = vadd.f32 1e-05, %v2754_v17 }
0x1439   : > { %4233 = vrsqrt.f32 %v2755_v5 }
0x1446   : > { %v4234_v18 = vpop.eup %4233 }
0x1447   : > { %v2757_v20 = vmul.f32 %v4234_v18, %v5059_v45  ;;  %v4166_v45 = vld [vmem:[%s5265_s10 + $0x38] sm:$0xff]  }
0x1449   : > { %v2764_v25 = vmul.f32 %v3629_v19, %v2757_v20 }
0x144b   : > { %v5099_v26 = vadd.f32 %v3630_v21, %v2764_v25 }
0x144d   : > { %v3061_v28 = vpack.c.bf16 %v5099_v26, %v5099_v26 }
0x144f   : > { %3654 = vmatmul.mubr.msk.bf16.vlgmr.msra.gmra.mxu0 %vm1160_vm2, %v3061_v28 }
0x1450   : > { %3760 = vmatpush3.bf16.msra.mxu0 %v4166_v45 }
0x1451   : > { %3761 = vmatprep.subr.bf16.mxu0 %v4167_v48 }
0x1454   : > { %3762 = vmatpush3.bf16.msra.mxu0 %v4168_v49 }
0x1455   : > { %3763 = vmatprep.subr.bf16.mxu0 %v4169_v50 }
0x1458   : > { %3764 = vmatpush3.bf16.msra.mxu0 %v4170_v51 }
0x1459   : > { %3765 = vmatprep.subr.bf16.mxu0 %v4171_v22 }
0x145c   : > { %3766 = vmatpush3.bf16.msra.mxu0 %v4172_v44 }
0x145d   : > { %3767 = vmatprep.subr.bf16.mxu0 %v4173_v52 }
0x1460   : > { %3768 = vmatpush3.bf16.msra.mxu0 %v4174_v47 }
0x1461   : > { %3769 = vmatprep.subr.bf16.mxu0 %v4175_v54 }
0x1464   : > { %3770 = vmatpush3.bf16.msra.mxu0 %v4176_v59 }
0x1465   : > { %3771 = vmatprep.subr.bf16.mxu0 %v4177_v61 }
0x1468   : > { %3772 = vmatpush3.bf16.msra.mxu0 %v4178_v2 }
0x1469   : > { %3773 = vmatprep.subr.bf16.mxu0 %v4179_v3 }
0x146c   : > { %3774 = vmatpush3.bf16.msra.mxu0 %v4180_v11 }
0x1486   : > { %v2852_v29 = vpop.f32.mrf.mxu0 }
0x1487   : > { %v2853_v30 = vadd.f32 %v3631_v0, %v2852_v29 }
0x1488   : > { %v3971_v31 = vpop.f32.mrf.mxu0 }
0x1489   : > { %v2861_v32 = vmul.f32 0.044715, %v2853_v30  ;;  %v2859_v57 = vmul.f32 0.5, %v2853_v30 }
0x148a   : > { %v2855_v33 = vpop.f32.mrf.mxu0 }
0x148b   : > { %v2863_v34 = vmul.f32 %v2861_v32, %v2853_v30  ;;  %v2856_v35 = vadd.f32 %v3631_v0, %v2855_v33 }
0x148c   : > { %v3972_v36 = vpop.f32.mrf.mxu0 }
0x148d   : > { %v2865_v24 = vmul.f32 %v2863_v34, %v2853_v30  ;;  %v2862_v37 = vmul.f32 0.044715, %v2856_v35  ;;  %v2860_v58 = vmul.f32 0.5, %v2856_v35 }
0x148f   : > { %v2867_v38 = vadd.f32 %v2865_v24, %v2853_v30  ;;  %v2864_v39 = vmul.f32 %v2862_v37, %v2856_v35 }
0x1491   : > { %v2869_v40 = vmul.f32 0.7978846, %v2867_v38  ;;  %v2866_v41 = vmul.f32 %v2864_v39, %v2856_v35 }
0x1493   : > { %4235 = vtanh.f32 %v2869_v40  ;;  %v2868_v43 = vadd.f32 %v2866_v41, %v2856_v35  ;;  %v3635_v41 = vld [vmem:[%s5267_s26] ss:$0 sm:$0xff]  ;;  %s3682_s26 = sshll.u32 %s4701_s0, 8 }
0x1494   : > { %s5145_s1 = scalar_lea.hbm %s4673_s20, %s3682_s26 }
0x1495   : > { %v2870_v46 = vmul.f32 0.7978846, %v2868_v43 }
0x1497   : > { %4237 = vtanh.f32 %v2870_v46 }
0x14a0   : > { %v4236_v53 = vpop.eup %4235 }
0x14a1   : > { %v2873_v55 = vadd.f32 1.0, %v4236_v53  ;;  %v3655_v53 = vld [vmem:[#allocation8] ss:$0 sm:$0xff] }
0x14a3   : > { %v2875_v62 = vmul.f32 %v2873_v55, %v2859_v57 }
0x14a4   : > { %v4238_v56 = vpop.eup %4237 }
0x14a5   : > { %v2874_v9 = vadd.f32 1.0, %v4238_v56 }
0x14a7   : > { %v2876_v63 = vmul.f32 %v2874_v9, %v2860_v58 }
0x14a9   : > { %v2877_v1 = vpack.c.bf16 %v2876_v63, %v2875_v62 }
0x14ab   : > { %3990 = vmatmul.mubr.bf16.vlgmr.msra.gmra.mxu1 %v2877_v1 }
0x150f   : > { %v3150_v27 = vpop.f32.mrf.mxu0 }
0x1510   : > { %v3151_v14 = vadd.f32 %v3150_v27, %v3066_v10 }
0x1511   : > { %v3152_v15 = vpop.f32.mrf.mxu0 }
0x1512   : > { %v3159_v16 = vmul.f32 0.044715, %v3151_v14  ;;  %v3153_v17 = vadd.f32 %v3152_v15, %v3070_v12  ;;  %v3157_v35 = vmul.f32 0.5, %v3151_v14 }
0x1513   : > { %v3154_v5 = vpop.f32.mrf.mxu0 }
0x1514   : > { %v3161_v18 = vmul.f32 %v3159_v16, %v3151_v14  ;;  %v3160_v19 = vmul.f32 0.044715, %v3153_v17  ;;  %v3158_v36 = vmul.f32 0.5, %v3153_v17 }
0x1515   : > { %v3155_v20 = vpop.f32.mrf.mxu0 }
0x1516   : > { %v3163_v21 = vmul.f32 %v3161_v18, %v3151_v14  ;;  %v3162_v25 = vmul.f32 %v3160_v19, %v3153_v17  ;;  %v3645_v18 = vld [vmem:[#allocation7] ss:$0 sm:$0xff] }
0x1518   : > { %v3165_v28 = vadd.f32 %v3163_v21, %v3151_v14  ;;  %v3164_v0 = vmul.f32 %v3162_v25, %v3153_v17 }
0x151a   : > { %v3167_v29 = vmul.f32 0.7978846, %v3165_v28  ;;  %v3166_v30 = vadd.f32 %v3164_v0, %v3153_v17  ;;  %v3644_v17 = vld [vmem:[%s5268_s18] ss:$0 sm:$0xff]  ;;  %s3369_s18 = sshll.u32 %s1023_s7, 4  ;;  %s5147_s18 = int_to_ptr.vmem [resolvable:$true] %s3369_s18 }
0x151b   : > { %s4356_s3 = scalar_lea.vmem %s5147_s18, 256  ;;  %p4363_p2 = scmp.lt.s32.totalorder %s5147_s18, %s4361_s5 }
0x151c   : > { %v3168_v31 = vmul.f32 0.7978846, %v3166_v30  ;;  %4239 = vtanh.f32 %v3167_v29  ;;  %p4357_p6 = scmp.ne.s32.totalorder %s5147_s18, %s4356_s3  ;;  %p4364_p3 = scmp.lt.s32.totalorder %s4362_s6, %s4356_s3 }
0x151e   : > { %4241 = vtanh.f32 %v3168_v31  ;;  %p4358_p0 = pnand %p4357_p6, %p5269_p10  ;;  %p4365_p4 = por %p4364_p3, %p4363_p2 }
0x1520   : > { %p4359_p1 = pneg %p4358_p0 }
0x1522   : > { %p4366_p7 = pnand %p4365_p4, %p4359_p1 }
0x1529   : > { %v4240_v32 = vpop.eup %4239 }
0x152a   : > { %v3171_v33 = vadd.f32 1.0, %v4240_v32 }
0x152b   : > { %v4242_v34 = vpop.eup %4241 }
0x152c   : > { %v3172_v24 = vadd.f32 1.0, %v4242_v34  ;;  %v3173_v37 = vmul.f32 %v3171_v33, %v3157_v35 }
0x152e   : > { %v3174_v38 = vmul.f32 %v3172_v24, %v3158_v36  ;;  %v3175_v40 = vpack.c.bf16 %v3173_v37, %v3173_v37 }
0x1530   : > { %v3176_v39 = vpack.c.bf16 %v3174_v38, %v3174_v38 }
0x1532   : > { %3311 = vmatprep.mubr.bf16.mxu0 %v3176_v39 }
0x1533   : > { %3312 = vmatmul.mubr.bf16.vlgmr.msra.gmra.mxu0 %v3175_v40 }
0x156b   : > { %v2966_v42 = vpop.f32.mrf.mxu1 }
0x156c   : > { %v2967_v43 = vadd.f32 %v3635_v41, %v2966_v42 }
0x156d   : > { %v3991_v45 = vpop.f32.mrf.mxu1 }
0x156e   : > { %v2973_v46 = vadd.f32 %v2967_v43, %v5067_v60 }
0x156f   : > { %v2969_v48 = vpop.f32.mrf.mxu1 }
0x1570   : > { %v2970_v49 = vadd.f32 %v3635_v41, %v2969_v48  ;;  %v2975_v50 = vsel %vm1085_vm1, %v2973_v46, 0.0 }
0x1571   : > { %2976 = vadd.xlane.f32.xlu0 %v2975_v50  ;;  %v3992_v51 = vpop.f32.mrf.mxu1 }
0x1572   : > { %v2974_v22 = vadd.f32 %v2970_v49, %v5069_v13 }
0x1574   : > { %v2978_v44 = vsel %vm1085_vm1, %v2974_v22, 0.0 }
0x1575   : > { %2979 = vadd.xlane.f32.xlu1 %v2978_v44 }
0x15f3   : > { %v3775_v52 = vpop.f32.mrf.mxu0 }
0x15f5   : > { %v3776_v47 = vpop.f32.mrf.mxu0 }
0x15f6   : > { %v3777_v54 = vadd.f32 %v3776_v47, %v3775_v52 }
0x15f7   : > { %v3778_v55 = vpop.f32.mrf.mxu0 }
0x15f8   : > { %v3314_v56 = vadd.f32 %v3777_v54, %v3655_v53 }
0x15f9   : > { %v3779_v57 = vpop.f32.mrf.mxu0 }
0x15fa   : > { %v2977_v58 = vpop.xlane.xlu0 %2976  ;;  %v3319_v60 = vadd.f32 %v3314_v56, %v5099_v26 }
0x15fb   : > { %v2981_v9 = vmul.f32 0.03125, %v2977_v58 }
0x15fc   : > { %v3320_v59 = vsel %vm1160_vm2, %v3319_v60, 0.0 }
0x15fd   : > { %v2983_v61 = vsub.f32 %v2973_v46, %v2981_v9  ;;  %3321 = vadd.xlane.f32.xlu1 %v3320_v59 }
0x15fe   : > { %v2980_v62 = vpop.xlane.xlu1 %2979 }
0x15ff   : > { %v2982_v13 = vmul.f32 0.03125, %v2980_v62  ;;  %v2985_v63 = vmul.f32 %v2983_v61, %v2983_v61 }
0x1601   : > { %v2984_v1 = vsub.f32 %v2974_v22, %v2982_v13  ;;  %v2987_v2 = vsel %vm1085_vm1, %v2985_v63, 0.0 }
0x1602   : > { %2988 = vadd.xlane.f32.xlu1 %v2987_v2 }
0x1603   : > { %v2986_v3 = vmul.f32 %v2984_v1, %v2984_v1 }
0x1605   : > { %v2990_v11 = vsel %vm1085_vm1, %v2986_v3, 0.0 }
0x1606   : > { %2991 = vadd.xlane.f32.xlu1 %v2990_v11 }
0x1686   : > { %v3322_v4 = vpop.xlane.xlu1 %3321 }
0x1687   : > { %v3323_v26 = vmul.f32 0.015625, %v3322_v4 }
0x1689   : > { %v5131_v6 = vsub.f32 %v3319_v60, %v3323_v26 }
0x168b   : > { %v2989_v7 = vpop.xlane.xlu1 %2988  ;;  %v3325_v8 = vmul.f32 %v5131_v6, %v5131_v6 }
0x168c   : > { %v2993_v23 = vmul.f32 0.03125, %v2989_v7 }
0x168d   : > { %v3326_v10 = vsel %vm1160_vm2, %v3325_v8, 0.0 }
0x168e   : > { %v2995_v12 = vadd.f32 1e-05, %v2993_v23  ;;  %3327 = vadd.xlane.f32.xlu1 %v3326_v10 }
0x168f   : > { %v2992_v27 = vpop.xlane.xlu1 %2991 }
0x1690   : > { %4243 = vrsqrt.f32 %v2995_v12  ;;  %v2994_v14 = vmul.f32 0.03125, %v2992_v27 }
0x1692   : > { %v2996_v15 = vadd.f32 1e-05, %v2994_v14 }
0x1694   : > { %4245 = vrsqrt.f32 %v2996_v15 }
0x169d   : > { %v4244_v16 = vpop.eup %4243 }
0x169e   : > { %v2999_v5 = vmul.f32 %v4244_v16, %v2983_v61 }
0x16a0   : > { %v3007_v19 = vmul.f32 %v3644_v17, %v2999_v5 }
0x16a1   : > { %v4246_v20 = vpop.eup %4245 }
0x16a2   : > { %v3015_v21 = vadd.f32 %v3645_v18, %v3007_v19  ;;  %v3000_v25 = vmul.f32 %v4246_v20, %v2984_v1 }
0x16a4   : > { %v3008_v28 = vmul.f32 %v3644_v17, %v3000_v25  ;;  %3347 = vst.msk [vmem:[%s1023_s7] sm:$0xff] %vm1085_vm1, %v3015_v21 }
0x16a6   : > { %v3016_v0 = vadd.f32 %v3645_v18, %v3008_v28 }
0x16a8   : > { %3348 = vst.msk [vmem:[%s1023_s7 + $0x8] sm:$0xff] %vm1085_vm1, %v3016_v0 }
0x16a9   : > { %4369 = shalt.err (!%p4366_p7)
}
0x16aa   : > { %s4370_s7 = scalar_lea.hbm %s5145_s1, 256  ;;  %s4374_s26 = scalar_lea.hbm %s4673_s20, 512 }
0x16ab   : > { %p4371_p9 = scmp.ne.s32.totalorder %s5145_s1, %s4370_s7  ;;  %p4375_p11 = scmp.lt.s32.totalorder %s5145_s1, %s4673_s20 }
0x16ac   : > { %p4376_p12 = scmp.lt.s32.totalorder %s4374_s26, %s4370_s7 }
0x16ad   : > { %p4372_p13 = pnand %p4371_p9, %p5269_p10 }
0x16ae   : > { %p4377_p5 = por %p4376_p12, %p4375_p11 }
0x16af   : > { %p4373_p8 = pneg %p4372_p13 }
0x16b1   : > { %p4378_p6 = pnand %p4377_p5, %p4373_p8 }
0x16b3   : > { %4381 = shalt.err (!%p4378_p6)
}
0x16b4   : > { %s4512_s5 = smov 128   ;;  %s4513_s3 = smov 8   ;;  %v3672_v33 = vld [vmem:[%s4663_s27] ss:$0 sm:$0xff] }
0x16b5   : > { %4009 = dma.vmem_to_hbm [thread:$0]  (%p5269_p10), %s5147_s18, 256, %s5145_s1, %s3351_s2, %s4512_s5, %s4512_s5, %s4513_s3  }
0x16b6   : > { %s3573_s6 = sshll.u32 %s5137_s22, 3  ;;  %v3673_v35 = vld [vmem:[%s4668_s4] ss:$0 sm:$0xff]  ;;  %s3678_s16 = sshll.u32 %s4701_s0, 7 }
0x16b7   : > { %s1030_s7 = scalar_lea.vmem [#allocation11], %s3573_s6  ;;  %s3383_s8 = scalar_lea.hbm %s4678_s12, %s3678_s16 }
0x16b8   : > { %s3385_s26 = sshll.u32 %s1030_s7, 4  ;;  %s3356_s2 = scalar_lea.sflag [#allocation12], %s5137_s22  ;;  %s3386_s26 = int_to_ptr.vmem [resolvable:$true] %s3385_s26 }
0x16b9   : > { %s4382_s1 = scalar_lea.vmem %s3386_s26, 128  ;;  %s4514_s18 = smov [#allocation11]  }
0x16ba   : > { %p4383_p0 = scmp.ne.s32.totalorder %s3386_s26, %s4382_s1  ;;  %s4386_s5 = sshll.u32 %s4514_s18, 4  ;;  %s4387_s5 = int_to_ptr.vmem [resolvable:$false] %s4386_s5 }
0x16bb   : > { %s4388_s3 = scalar_lea.vmem %s4387_s5, 256  ;;  %p4389_p3 = scmp.lt.s32.totalorder %s3386_s26, %s4387_s5 }
0x16bc   : > { %p4384_p1 = pnand %p4383_p0, %p5269_p10  ;;  %p4390_p4 = scmp.lt.s32.totalorder %s4388_s3, %s4382_s1 }
0x16be   : > { %p4385_p2 = pneg %p4384_p1  ;;  %p4391_p7 = por %p4390_p4, %p4389_p3 }
0x16c0   : > { %p4392_p9 = pnand %p4391_p7, %p4385_p2 }
0x1717   : > { %v3328_v29 = vpop.xlane.xlu1 %3327 }
0x1718   : > { %v3329_v30 = vmul.f32 0.015625, %v3328_v29 }
0x171a   : > { %v3330_v31 = vadd.f32 1e-05, %v3329_v30 }
0x171c   : > { %4247 = vrsqrt.f32 %v3330_v31 }
0x1729   : > { %v4248_v32 = vpop.eup %4247 }
0x172a   : > { %v3332_v34 = vmul.f32 %v4248_v32, %v5131_v6 }
0x172c   : > { %v3339_v36 = vmul.f32 %v3672_v33, %v3332_v34 }
0x172e   : > { %v3346_v24 = vadd.f32 %v3673_v35, %v3339_v36 }
0x1730   : > { %3349 = vst.msk [vmem:[%s1030_s7] sm:$0xff] %vm1160_vm2, %v3346_v24 }
0x1731   : > { %4395 = shalt.err (!%p4392_p9)
}
0x1732   : > { %s4396_s0 = scalar_lea.hbm %s3383_s8, 128  ;;  %s4400_s22 = scalar_lea.hbm %s4678_s12, 256 }
0x1733   : > { %p4397_p13 = scmp.ne.s32.totalorder %s3383_s8, %s4396_s0  ;;  %p4401_p12 = scmp.lt.s32.totalorder %s3383_s8, %s4678_s12 }
0x1734   : > { %p4402_p5 = scmp.lt.s32.totalorder %s4400_s22, %s4396_s0 }
0x1735   : > { %p4398_p8 = pnand %p4397_p13, %p5269_p10 }
0x1736   : > { %p4403_p6 = por %p4402_p5, %p4401_p12 }
0x1737   : > { %p4399_p11 = pneg %p4398_p8 }
0x1739   : > { %p4404_p0 = pnand %p4403_p6, %p4399_p11 }
0x173b   : > { %4407 = shalt.err (!%p4404_p0)
}
0x173c   : > { %4010 = dma.vmem_to_hbm [thread:$0]  (%p5269_p10), %s3386_s26, 128, %s3383_s8, %s3356_s2  }
0x173d PF: > { %s5270_s6 = sld [smem:[#allocation36_spill]]  ;;  %p4041_p1 = scmp.ge.s32.totalorder %s4458_s28, 2 }
0x173e   : > { %s5271_s16 = sld [smem:[#allocation40_spill]] }
0x1743   : > { %s3397_s7 = sand.u32 1, %s5270_s6  }
0x1744   : > { %p5272_p2 = scmp.ne.s32.totalorder %s5271_s16, 0  ;;  %s3398_s1 = scalar_lea.sflag [#allocation4], %s3397_s7 }
0x1746   : > { %p4027_p3 = pnand %p4041_p1, %p5272_p2 }
0x1748   : > { %p4028_p4 = pneg %p4027_p3 }
0x174a   : > { %4437 = dma.done.wait (%p4028_p4), %s3398_s1, 256  }
0x174b   : > { %4439 = vsyncadd (%p4028_p4), %s3398_s1, 4294967040  ;;  %s3407_s18 = scalar_lea.sflag [#allocation12], %s3397_s7 }
0x174c   : > { %4441 = dma.done.wait (%p4028_p4), %s3407_s18, 128  }
0x174d   : > { %4443 = vsyncadd (%p4028_p4), %s3407_s18, 4294967168  ;;  %s5273_s28 = sld [smem:[#allocation38_spill]]  ;;  %s5276_s22 = smov %s4450_s23 }
0x174e   : > { %s5274_s5 = sld [smem:[#allocation37_spill]] }
0x174f   : > { %s5275_s26 = sld [smem:[#allocation39_spill]] }
0x1753   : > { %p80_p10 = scmp.ge.s32.totalorder %s5273_s28, 4  }
0x1754   : > { %s5277_s23 = smov %s5274_s5 }
0x1755   :  { %82 = sbr.rel (!%p80_p10) target bundleno = 61 (0x3d), region = 243 }
0x175a   :  { %3412 = vsyncpa [#allocation3], 1 }
0x175b   :  { %3414 = vsyncpa [#allocation3 + $0x1], 1 }
0x175c   :  { %3415 = vsyncpa [#allocation6], 1 }
0x175d   :  { %3416 = vsyncpa [#allocation9], 1 }
0x175e   :  { %3417 = vsyncpa [#allocation4], 1 }
0x175f   :  { %3419 = vsyncpa [#allocation4 + $0x1], 1 }
0x1760   :  { %3420 = vsyncpa [#allocation12], 1 }
0x1761   :  { %3422 = vsyncpa [#allocation12 + $0x1], 1 }

</bundles_post_ra>
